<compile_context>
chip_gen: v7x
topology: tpu7x:2x2x1
jax: 0.10.0
libtpu: 0.0.40
codegen_flags: <defaults>
</compile_context>

<pallas_src>
import functools
import math

import jax
import jax.numpy as jnp
from jax import lax
from jax.experimental import pallas as pl
from jax.experimental.pallas import tpu as pltpu

_EPS = 1e-5
_INV_SQRT2 = 0.7071067811865476


def _layernorm(x, w, b):
    mu = jnp.mean(x, axis=-1, keepdims=True)
    var = jnp.mean((x - mu) ** 2, axis=-1, keepdims=True)
    return (x - mu) * lax.rsqrt(var + _EPS) * w + b


# --------------------------------------------------------------------------
# Kernel 1: norm1 + qkv projection (per batch element, per token tile).
#   qkv_ref : (tn, 3C) x.dtype  -- single lane-dense store (returned q/k/v)
#   qs_ref  : (tn, C)  bf16     -- Q pre-scaled by head_dim**-0.5
#   kv_ref  : (tn, 2C) bf16     -- the pass-2 resident K/V slab
# --------------------------------------------------------------------------
def _qkv_kernel(x_ref, ln1w_ref, ln1b_ref, wqkv_ref, qkv_ref, qs_ref, kv_ref,
                *, scale):
    x = x_ref[0].astype(jnp.float32)                      # (tn, C)
    xn = _layernorm(x, ln1w_ref[0], ln1b_ref[0])          # f32
    # wqkv is pre-transposed (C, 3C) bf16; bf16 x bf16 -> f32 accumulate on MXU.
    qkv = jnp.dot(xn.astype(jnp.bfloat16), wqkv_ref[...],
                  preferred_element_type=jnp.float32)     # (tn, 3C)
    C = qs_ref.shape[-1]
    qkv_ref[0] = qkv.astype(qkv_ref.dtype)
    qs_ref[0] = (qkv[:, :C] * scale).astype(jnp.bfloat16)   # fold attn scale into Q
    kv_ref[0] = qkv[:, C:].astype(jnp.bfloat16)


# --------------------------------------------------------------------------
# Kernel 2: attention (query tile vs full K/V) + proj + norm2 + MLP + residuals
# --------------------------------------------------------------------------
def _attn_mlp_kernel(x_ref, q_ref, kv_ref,
                     wproj_ref, bproj_ref, ln2w_ref, ln2b_ref,
                     wfc1_ref, bfc1_ref, wfc2_ref, bfc2_ref,
                     xout_ref, hid_ref, o_acc_ref,
                     *, num_heads, n_valid, approx_gelu):
    x = x_ref[0].astype(jnp.float32)                      # (tq, C)
    tq, C = x.shape
    hd = C // num_heads

    q = q_ref[0]                                          # (tq, C) bf16, pre-scaled
    kv = kv_ref[0]                                        # (Np, 2C) bf16
    k = kv[:, :C]
    v = kv[:, C:]
    n_pad = k.shape[0]

    # Per-head attention, results written straight into the f32 scratch
    # accumulator (no list + concatenate relayout).  NOTE: for hd < 128 each
    # dot under-fills the 256-wide MXU and the hd-wide lane slices are not
    # vreg-aligned; acceptable since the big dots (qkv / proj / fc1 / fc2 with
    # K = C or Hf) carry the MXU load.
    for h in range(num_heads):
        sl = slice(h * hd, (h + 1) * hd)
        s = lax.dot_general(q[:, sl], k[:, sl], (((1,), (1,)), ((), ())),
                            preferred_element_type=jnp.float32)      # (tq, Np)
        if n_valid < n_pad:                 # static branch: mask padded keys
            kidx = lax.broadcasted_iota(jnp.int32, s.shape, 1)
            s = jnp.where(kidx < n_valid, s, -1e30)
        m = jnp.max(s, axis=-1, keepdims=True)
        e = jnp.exp(s - m)
        l = jnp.sum(e, axis=-1, keepdims=True)
        p = e * pl.reciprocal(l, approx=True)             # EUP reciprocal
        o_acc_ref[:, sl] = jnp.dot(p.astype(jnp.bfloat16), v[:, sl],
                                   preferred_element_type=jnp.float32)

    attn_out = jnp.dot(o_acc_ref[...].astype(jnp.bfloat16), wproj_ref[...],
                       preferred_element_type=jnp.float32) + bproj_ref[0]

    # residual 1 (ls1 = Identity since init_values=None)
    x1 = x + attn_out

    x2n = _layernorm(x1, ln2w_ref[0], ln2b_ref[0])
    hpre = jnp.dot(x2n.astype(jnp.bfloat16), wfc1_ref[...],
                   preferred_element_type=jnp.float32) + bfc1_ref[0]
    if approx_gelu:
        hact = jax.nn.gelu(hpre, approximate=True)        # tanh -> EUP slot
    else:
        hact = 0.5 * hpre * (1.0 + lax.erf(hpre * _INV_SQRT2))   # PyTorch-exact GELU
    mlp_out = jnp.dot(hact.astype(jnp.bfloat16), wfc2_ref[...],
                      preferred_element_type=jnp.float32) + bfc2_ref[0]

    hid_ref[0] = mlp_out.astype(hid_ref.dtype)
    # residual 2 (ls2 = Identity)
    xout_ref[0] = (x1 + mlp_out).astype(xout_ref.dtype)


# --------------------------------------------------------------------------
# Wrapper helpers
# --------------------------------------------------------------------------
def _round_up(a, m):
    return ((a + m - 1) // m) * m


def _nbytes(shape, dtype):
    return int(math.prod(shape)) * jnp.dtype(dtype).itemsize


def _choose_tiling(n, max_tile=256):
    """Pick a multiple-of-8 token tile and the padded token count.

    Prefers exact divisors (no padding); among those prefers >=2 token tiles
    (so both v7x TensorCores get work even at batch 1), then the largest tile.
    If no aligned divisor exists, pads the token axis (padded keys are masked
    inside the attention kernel)."""
    n8 = _round_up(n, 8)
    upper = (max(8, min(max_tile, n8)) // 8) * 8
    divisors = [t for t in range(upper, 7, -8) if n % t == 0]
    multi = [t for t in divisors if n // t >= 2]
    if multi:
        return multi[0], n
    if divisors:
        return divisors[0], n
    floor_t = min(64, upper)
    best = None
    for t in range(upper, floor_t - 1, -8):
        n_pad = _round_up(n, t)
        key = (n_pad // t < 2, n_pad - n, -t)
        if best is None or key < best[0]:
            best = (key, t, n_pad)
    return best[1], best[2]


def _vmem_cap_bytes():
    # Generation-aware cap (v5e/v6e: 128 MiB physical, v7x: 64 MiB) minus ~20%
    # headroom for Mosaic's internal scratch.
    try:
        cap = getattr(pltpu.get_tpu_info(), "vmem_capacity_bytes", None)
        if cap:
            return int(int(cap) * 0.8)
    except Exception:
        pass
    return 64 << 20


def _vmem_limit(need_bytes):
    return int(min(max(int(need_bytes) + (8 << 20), 32 << 20), _vmem_cap_bytes()))


def _const_spec(a, single_buffer):
    # Whole-array block with a constant index map (the block never changes).
    zeros = (0,) * a.ndim
    if single_buffer:
        return pl.BlockSpec(a.shape, lambda b, t, _z=zeros: _z,
                            pipeline_mode=pl.Buffered(1))
    return pl.BlockSpec(a.shape, lambda b, t, _z=zeros: _z)


# --------------------------------------------------------------------------
# Forward wrapper
# --------------------------------------------------------------------------
def block_ds_forward(x, params, num_heads, *, token_tile=None,
                     single_buffer_consts=True, approx_gelu=False):
    B, N, C = x.shape
    assert C % num_heads == 0
    hd = C // num_heads
    scale = hd ** -0.5
    Hf = params['wfc1'].shape[0]

    if token_tile is None:
        tn, n_pad = _choose_tiling(N)
    else:
        tn = int(token_tile)
        assert tn % 8 == 0, "token_tile must be a multiple of 8"
        n_pad = _round_up(N, tn)

    # Pad the token axis if needed; padded key positions are masked inside the
    # attention kernel and padded rows of every output are sliced off below.
    x_p = x if n_pad == N else jnp.pad(x, ((0, 0), (0, n_pad - N), (0, 0)))

    # Pre-transpose all linear weights to (in, out) and cast MXU operands to
    # bf16 once in the wrapper (layout plumbing, not per-grid-step work).
    wqkv_t = jnp.asarray(params['wqkv']).T.astype(jnp.bfloat16)    # (C, 3C)
    wproj_t = jnp.asarray(params['wproj']).T.astype(jnp.bfloat16)  # (C, C)
    wfc1_t = jnp.asarray(params['wfc1']).T.astype(jnp.bfloat16)    # (C, Hf)
    wfc2_t = jnp.asarray(params['wfc2']).T.astype(jnp.bfloat16)    # (Hf, C)
    ln1w, ln1b = params['ln1w'], params['ln1b']
    ln2w, ln2b = params['ln2w'], params['ln2b']
    bproj, bfc1, bfc2 = params['bproj'], params['bfc1'], params['bfc2']

    xi = jnp.dtype(x.dtype).itemsize
    cbuf = 1 if single_buffer_consts else 2
    consts1 = [ln1w, ln1b, wqkv_t]
    consts2 = [wproj_t, bproj, ln2w, ln2b, wfc1_t, bfc1, wfc2_t, bfc2]

    # ------------------------- pass 1: norm1 + qkv -------------------------
    need1 = (2 * (tn * C * xi + tn * 3 * C * xi + tn * C * 2 + tn * 2 * C * 2)
             + cbuf * sum(_nbytes(a.shape, a.dtype) for a in consts1)
             + 2 * (tn * 4 * C) * 4)                 # in-kernel f32 temporaries
    cost1 = pl.CostEstimate(
        flops=2 * B * n_pad * C * 3 * C,
        transcendentals=2 * B * n_pad,               # LN rsqrt
        bytes_accessed=(_nbytes((B, n_pad, C), x.dtype)
                        + sum(_nbytes(a.shape, a.dtype) for a in consts1)
                        + _nbytes((B, n_pad, 3 * C), x.dtype)
                        + _nbytes((B, n_pad, 3 * C), jnp.bfloat16)),
    )
    qkv, qs, kvs = pl.pallas_call(
        functools.partial(_qkv_kernel, scale=scale),
        grid=(B, n_pad // tn),
        in_specs=[
            pl.BlockSpec((1, tn, C), lambda b, t: (b, t, 0)),
            _const_spec(ln1w, single_buffer_consts),
            _const_spec(ln1b, single_buffer_consts),
            _const_spec(wqkv_t, single_buffer_consts),
        ],
        out_specs=(
            pl.BlockSpec((1, tn, 3 * C), lambda b, t: (b, t, 0)),
            pl.BlockSpec((1, tn, C), lambda b, t: (b, t, 0)),
            pl.BlockSpec((1, tn, 2 * C), lambda b, t: (b, t, 0)),
        ),
        out_shape=(
            jax.ShapeDtypeStruct((B, n_pad, 3 * C), x.dtype),       # returned q/k/v
            jax.ShapeDtypeStruct((B, n_pad, C), jnp.bfloat16),      # scaled Q
            jax.ShapeDtypeStruct((B, n_pad, 2 * C), jnp.bfloat16),  # K/V slab
        ),
        compiler_params=pltpu.CompilerParams(
            dimension_semantics=("parallel", "parallel"),
            vmem_limit_bytes=_vmem_limit(need1)),
        cost_estimate=cost1,
    )(x_p, ln1w, ln1b, wqkv_t)

    # -------------- pass 2: attention + proj + norm2 + MLP -----------------
    need2 = (2 * (tn * C * xi + tn * C * 2 + n_pad * 2 * C * 2 + 2 * tn * C * xi)
             + cbuf * sum(_nbytes(a.shape, a.dtype) for a in consts2)
             + tn * C * 4                            # o_acc scratch
             + 2 * tn * n_pad * 4                    # score temporaries
             + 2 * tn * Hf * 4                       # fc1 pre-act / GELU
             + 3 * tn * C * 4)                       # x1 / x2n / attn_out
    cost2 = pl.CostEstimate(
        flops=(4 * B * n_pad * n_pad * C             # scores + attn@v
               + 2 * B * n_pad * C * C               # proj
               + 4 * B * n_pad * C * Hf),            # fc1 + fc2
        transcendentals=(B * num_heads * n_pad * n_pad    # exp
                         + B * n_pad * Hf                 # gelu
                         + B * num_heads * n_pad          # reciprocal
                         + 2 * B * n_pad),                # LN rsqrt
        bytes_accessed=(_nbytes((B, n_pad, C), x.dtype)
                        + _nbytes((B, n_pad, C), jnp.bfloat16)
                        + _nbytes((B, n_pad, 2 * C), jnp.bfloat16)
                        + sum(_nbytes(a.shape, a.dtype) for a in consts2)
                        + 2 * _nbytes((B, n_pad, C), x.dtype)),
    )
    kernel2 = functools.partial(_attn_mlp_kernel, num_heads=num_heads,
                                n_valid=N, approx_gelu=approx_gelu)
    x_out, hidden_out = pl.pallas_call(
        kernel2,
        # Grid order matters: token axis innermost so the full-K/V block's
        # constant-in-t index map avoids re-DMA of the dominant HBM read.
        grid=(B, n_pad // tn),
        in_specs=[
            pl.BlockSpec((1, tn, C), lambda b, t: (b, t, 0)),          # x (residual)
            pl.BlockSpec((1, tn, C), lambda b, t: (b, t, 0)),          # scaled Q tile
            pl.BlockSpec((1, n_pad, 2 * C), lambda b, t: (b, 0, 0)),   # full K/V (bf16)
            _const_spec(wproj_t, single_buffer_consts),
            _const_spec(bproj, single_buffer_consts),
            _const_spec(ln2w, single_buffer_consts),
            _const_spec(ln2b, single_buffer_consts),
            _const_spec(wfc1_t, single_buffer_consts),
            _const_spec(bfc1, single_buffer_consts),
            _const_spec(wfc2_t, single_buffer_consts),
            _const_spec(bfc2, single_buffer_consts),
        ],
        out_specs=(
            pl.BlockSpec((1, tn, C), lambda b, t: (b, t, 0)),
            pl.BlockSpec((1, tn, C), lambda b, t: (b, t, 0)),
        ),
        out_shape=(
            jax.ShapeDtypeStruct((B, n_pad, C), x.dtype),   # x out
            jax.ShapeDtypeStruct((B, n_pad, C), x.dtype),   # hidden_out (MLP output)
        ),
        scratch_shapes=[pltpu.VMEM((tn, C), jnp.float32)],  # per-head output acc
        compiler_params=pltpu.CompilerParams(
            dimension_semantics=("parallel", "parallel"),
            vmem_limit_bytes=_vmem_limit(need2)),
        cost_estimate=cost2,
    )(x_p, qs, kvs, wproj_t, bproj, ln2w, ln2b, wfc1_t, bfc1, wfc2_t, bfc2)

    # q/k/v are raw slices of the qkv projection (matches qkv_out in PyTorch).
    q = qkv[:, :N, 0:C]
    k = qkv[:, :N, C:2 * C]
    v = qkv[:, :N, 2 * C:3 * C]
    if n_pad != N:
        x_out = x_out[:, :N]
        hidden_out = hidden_out[:, :N]
    return x_out, (q, k, v), hidden_out


# ---------------------------------------------------------------------------
# Pure-JAX f32 reference (mirrors the PyTorch forward) for correctness checking.
# ---------------------------------------------------------------------------
def block_ds_reference(x, params, num_heads):
    B, N, C = x.shape
    hd = C // num_heads
    scale = hd ** -0.5

    def ln(z, w, b):
        mu = jnp.mean(z, axis=-1, keepdims=True)
        var = jnp.mean((z - mu) ** 2, axis=-1, keepdims=True)
        return (z - mu) / jnp.sqrt(var + _EPS) * w[0] + b[0]

    xn = ln(x, params['ln1w'], params['ln1b'])
    qkv = xn @ params['wqkv'].T                                   # (B, N, 3C)
    q, k, v = qkv[..., :C], qkv[..., C:2 * C], qkv[..., 2 * C:]
    qh = q.reshape(B, N, num_heads, hd).transpose(0, 2, 1, 3)
    kh = k.reshape(B, N, num_heads, hd).transpose(0, 2, 1, 3)
    vh = v.reshape(B, N, num_heads, hd).transpose(0, 2, 1, 3)
    attn = jax.nn.softmax(jnp.einsum('bhnd,bhmd->bhnm', qh, kh) * scale, axis=-1)
    o = jnp.einsum('bhnm,bhmd->bhnd', attn, vh).transpose(0, 2, 1, 3).reshape(B, N, C)
    attn_out = o @ params['wproj'].T + params['bproj'][0]
    x1 = x + attn_out

    x2n = ln(x1, params['ln2w'], params['ln2b'])
    h = x2n @ params['wfc1'].T + params['bfc1'][0]
    h = 0.5 * h * (1.0 + lax.erf(h * _INV_SQRT2))
    hidden_out = h @ params['wfc2'].T + params['bfc2'][0]
    x2 = x1 + hidden_out
    return x2, (q, k, v), hidden_out


if __name__ == "__main__":
    # Small but lane-friendly config: C multiple of 128 -> unmasked lane-dense
    # stores.  Two cases: an exactly-tiled N and an awkward N that exercises
    # the token-padding + key-masking path.
    num_heads = 4
    C = 128
    Hf = int(C * 4.0)

    key = jax.random.PRNGKey(0)
    keys = jax.random.split(key, 10)

    params = {
        'ln1w': jnp.ones((1, C), jnp.float32),
        'ln1b': jnp.zeros((1, C), jnp.float32),
        'wqkv': 0.1 * jax.random.normal(keys[1], (3 * C, C), jnp.float32),
        'wproj': 0.1 * jax.random.normal(keys[2], (C, C), jnp.float32),
        'bproj': 0.01 * jax.random.normal(keys[3], (1, C), jnp.float32),
        'ln2w': jnp.ones((1, C), jnp.float32),
        'ln2b': jnp.zeros((1, C), jnp.float32),
        'wfc1': 0.1 * jax.random.normal(keys[4], (Hf, C), jnp.float32),
        'bfc1': 0.01 * jax.random.normal(keys[5], (1, Hf), jnp.float32),
        'wfc2': 0.1 * jax.random.normal(keys[6], (C, Hf), jnp.float32),
        'bfc2': 0.01 * jax.random.normal(keys[7], (1, C), jnp.float32),
    }

    def run(xin, **kw):
        try:
            return block_ds_forward(xin, params, num_heads, **kw)
        except Exception:
            # pipeline_mode=pl.Buffered(1) (single-buffered constant blocks)
            # may not be supported by every jax/jaxlib; retry with defaults.
            return block_ds_forward(xin, params, num_heads,
                                    single_buffer_consts=False, **kw)

    def check(xin, outs, name):
        x_out, (q, k, v), hidden_out = outs
        r_x, (r_q, r_k, r_v), r_h = block_ds_reference(xin, params, num_heads)
        # The kernel feeds bf16 operands to the MXU (f32 accumulation) and uses
        # an approximate EUP reciprocal in the softmax, so allow bf16 slack.
        for a, b, nm in ((x_out, r_x, "x"), (q, r_q, "q"), (k, r_k, "k"),
                         (v, r_v, "v"), (hidden_out, r_h, "hidden")):
            assert jnp.allclose(a, b, atol=5e-2, rtol=5e-2), \
                f"{name}: mismatch in {nm}"

    # Case 1: N=16 (exact multiple-of-8 tiling chosen automatically).
    x1 = jax.random.normal(keys[0], (2, 16, C), dtype=jnp.float32)
    outs1 = run(x1)
    jax.block_until_ready(outs1)
    check(x1, outs1, "case1")

    # Case 2: N=20 with token_tile=8 -> padded to 24 tokens, padded keys masked.
    x2 = jax.random.normal(keys[8], (2, 20, C), dtype=jnp.float32)
    outs2 = run(x2, token_tile=8)
    jax.block_until_ready(outs2)
    check(x2, outs2, "case2")

    print("KERNEL_OK")
</pallas_src>

<mosaic_0001>
module attributes {stable_mosaic.version = 11 : i64} {
  func.func @_qkv_kernel(%arg0: i32, %arg1: i32, %arg2: memref<1x8x128xf32, #tpu.memory_space<vmem>>, %arg3: memref<1x128xf32, #tpu.memory_space<vmem>>, %arg4: memref<1x128xf32, #tpu.memory_space<vmem>>, %arg5: memref<128x384xbf16, #tpu.memory_space<vmem>>, %arg6: memref<1x8x384xf32, #tpu.memory_space<vmem>>, %arg7: memref<1x8x128xbf16, #tpu.memory_space<vmem>>, %arg8: memref<1x8x256xbf16, #tpu.memory_space<vmem>>) attributes {dimension_semantics = [#tpu.dimension_semantics<parallel>, #tpu.dimension_semantics<parallel>], iteration_bounds = array<i64: 2, 2>, scalar_prefetch = 0 : i64, scratch_operands = 0 : i64, tpu.core_type = #tpu.core_type<tc>, window_params = [{transform_indices = @transform_0, window_bounds = array<i64: 1, 8, 128>}, {pipeline_mode = #tpu.pipeline_mode<synchronous>, transform_indices = @transform_1, window_bounds = array<i64: 1, 128>}, {pipeline_mode = #tpu.pipeline_mode<synchronous>, transform_indices = @transform_2, window_bounds = array<i64: 1, 128>}, {pipeline_mode = #tpu.pipeline_mode<synchronous>, transform_indices = @transform_3, window_bounds = array<i64: 128, 384>}, {transform_indices = @transform_4, window_bounds = array<i64: 1, 8, 384>}, {transform_indices = @transform_5, window_bounds = array<i64: 1, 8, 128>}, {transform_indices = @transform_6, window_bounds = array<i64: 1, 8, 256>}]} {
    %c0 = arith.constant 0 : index
    %c0_0 = arith.constant 0 : index
    %c0_1 = arith.constant 0 : index
    %0 = vector.load %arg2[%c0, %c0_0, %c0_1] : memref<1x8x128xf32, #tpu.memory_space<vmem>>, vector<1x8x128xf32>
    %1 = vector.shape_cast %0 : vector<1x8x128xf32> to vector<8x128xf32>
    %c0_2 = arith.constant 0 : index
    %c0_3 = arith.constant 0 : index
    %2 = vector.load %arg3[%c0_2, %c0_3] : memref<1x128xf32, #tpu.memory_space<vmem>>, vector<1x128xf32>
    %3 = vector.shape_cast %2 : vector<1x128xf32> to vector<128xf32>
    %c0_4 = arith.constant 0 : index
    %c0_5 = arith.constant 0 : index
    %4 = vector.load %arg4[%c0_4, %c0_5] : memref<1x128xf32, #tpu.memory_space<vmem>>, vector<1x128xf32>
    %5 = vector.shape_cast %4 : vector<1x128xf32> to vector<128xf32>
    %cst = arith.constant dense<0.000000e+00> : vector<8xf32>
    %6 = vector.multi_reduction <add>, %1, %cst [1] : vector<8x128xf32> to vector<8xf32>
    %7 = vector.shape_cast %6 : vector<8xf32> to vector<8x1xf32>
    %cst_6 = arith.constant 1.280000e+02 : f32
    %8 = vector.broadcast %cst_6 : f32 to vector<8x1xf32>
    %9 = arith.divf %7, %8 : vector<8x1xf32>
    %10 = vector.broadcast %9 : vector<8x1xf32> to vector<8x128xf32>
    %11 = arith.subf %1, %10 : vector<8x128xf32>
    %12 = arith.mulf %11, %11 : vector<8x128xf32>
    %cst_7 = arith.constant dense<0.000000e+00> : vector<8xf32>
    %13 = vector.multi_reduction <add>, %12, %cst_7 [1] : vector<8x128xf32> to vector<8xf32>
    %14 = vector.shape_cast %13 : vector<8xf32> to vector<8x1xf32>
    %cst_8 = arith.constant 1.280000e+02 : f32
    %15 = vector.broadcast %cst_8 : f32 to vector<8x1xf32>
    %16 = arith.divf %14, %15 : vector<8x1xf32>
    %17 = vector.broadcast %9 : vector<8x1xf32> to vector<8x128xf32>
    %18 = arith.subf %1, %17 : vector<8x128xf32>
    %cst_9 = arith.constant 9.99999974E-6 : f32
    %19 = vector.broadcast %cst_9 : f32 to vector<8x1xf32>
    %20 = arith.addf %16, %19 : vector<8x1xf32>
    %21 = math.rsqrt %20 : vector<8x1xf32>
    %22 = vector.broadcast %21 : vector<8x1xf32> to vector<8x128xf32>
    %23 = arith.mulf %18, %22 : vector<8x128xf32>
    %24 = vector.shape_cast %3 : vector<128xf32> to vector<1x128xf32>
    %25 = vector.broadcast %24 : vector<1x128xf32> to vector<8x128xf32>
    %26 = arith.mulf %23, %25 : vector<8x128xf32>
    %27 = vector.shape_cast %5 : vector<128xf32> to vector<1x128xf32>
    %28 = vector.broadcast %27 : vector<1x128xf32> to vector<8x128xf32>
    %29 = arith.addf %26, %28 : vector<8x128xf32>
    %30 = arith.truncf %29 : vector<8x128xf32> to vector<8x128xbf16>
    %c0_10 = arith.constant 0 : index
    %c0_11 = arith.constant 0 : index
    %31 = vector.load %arg5[%c0_10, %c0_11] : memref<128x384xbf16, #tpu.memory_space<vmem>>, vector<128x384xbf16>
    %cst_12 = arith.constant dense<0.000000e+00> : vector<8x384xf32>
    %32 = tpu.matmul %30, %31, %cst_12 {dimension_numbers = #tpu.dot_dimension_numbers<[1], [0], [0], [1], [0, 0, 1, 1], [], []>} : vector<8x128xbf16>, vector<128x384xbf16>, vector<8x384xf32> -> vector<8x384xf32>
    %c0_13 = arith.constant 0 : index
    %c0_14 = arith.constant 0 : index
    %c0_15 = arith.constant 0 : index
    %33 = vector.load %arg6[%c0_13, %c0_14, %c0_15] : memref<1x8x384xf32, #tpu.memory_space<vmem>>, vector<1x8x384xf32>
    %34 = vector.shape_cast %33 : vector<1x8x384xf32> to vector<8x384xf32>
    %35 = vector.shape_cast %32 : vector<8x384xf32> to vector<1x8x384xf32>
    tpu.vector_store %arg6[%c0_13, %c0_14, %c0_15], %35 {strides = array<i32>} : memref<1x8x384xf32, #tpu.memory_space<vmem>>, vector<1x8x384xf32>,
    %36 = vector.extract_strided_slice %32 {offsets = [0, 0], sizes = [8, 128], strides = [1, 1]} : vector<8x384xf32> to vector<8x128xf32>
    %cst_16 = arith.constant 0.176776692 : f32
    %37 = vector.broadcast %cst_16 : f32 to vector<8x128xf32>
    %38 = arith.mulf %36, %37 : vector<8x128xf32>
    %39 = arith.truncf %38 : vector<8x128xf32> to vector<8x128xbf16>
    %c0_17 = arith.constant 0 : index
    %c0_18 = arith.constant 0 : index
    %c0_19 = arith.constant 0 : index
    %40 = vector.load %arg7[%c0_17, %c0_18, %c0_19] : memref<1x8x128xbf16, #tpu.memory_space<vmem>>, vector<1x8x128xbf16>
    %41 = vector.shape_cast %40 : vector<1x8x128xbf16> to vector<8x128xbf16>
    %42 = vector.shape_cast %39 : vector<8x128xbf16> to vector<1x8x128xbf16>
    tpu.vector_store %arg7[%c0_17, %c0_18, %c0_19], %42 {strides = array<i32>} : memref<1x8x128xbf16, #tpu.memory_space<vmem>>, vector<1x8x128xbf16>,
    %43 = vector.extract_strided_slice %32 {offsets = [0, 128], sizes = [8, 256], strides = [1, 1]} : vector<8x384xf32> to vector<8x256xf32>
    %44 = arith.truncf %43 : vector<8x256xf32> to vector<8x256xbf16>
    %c0_20 = arith.constant 0 : index
    %c0_21 = arith.constant 0 : index
    %c0_22 = arith.constant 0 : index
    %45 = vector.load %arg8[%c0_20, %c0_21, %c0_22] : memref<1x8x256xbf16, #tpu.memory_space<vmem>>, vector<1x8x256xbf16>
    %46 = vector.shape_cast %45 : vector<1x8x256xbf16> to vector<8x256xbf16>
    %47 = vector.shape_cast %44 : vector<8x256xbf16> to vector<1x8x256xbf16>
    tpu.vector_store %arg8[%c0_20, %c0_21, %c0_22], %47 {strides = array<i32>} : memref<1x8x256xbf16, #tpu.memory_space<vmem>>, vector<1x8x256xbf16>,
    return
  }
  func.func @transform_0(%arg0: i32, %arg1: i32) -> (i32, i32, i32) {
    %c0_i32 = arith.constant 0 : i32
    %c0_i32_0 = arith.constant 0 : i32
    return %arg0, %arg1, %c0_i32 : i32, i32, i32
  }
  func.func @transform_1(%arg0: i32, %arg1: i32) -> (i32, i32) {
    %c0_i32 = arith.constant 0 : i32
    %c0_i32_0 = arith.constant 0 : i32
    %c0_i32_1 = arith.constant 0 : i32
    return %c0_i32, %c0_i32_0 : i32, i32
  }
  func.func @transform_2(%arg0: i32, %arg1: i32) -> (i32, i32) {
    %c0_i32 = arith.constant 0 : i32
    %c0_i32_0 = arith.constant 0 : i32
    %c0_i32_1 = arith.constant 0 : i32
    return %c0_i32, %c0_i32_0 : i32, i32
  }
  func.func @transform_3(%arg0: i32, %arg1: i32) -> (i32, i32) {
    %c0_i32 = arith.constant 0 : i32
    %c0_i32_0 = arith.constant 0 : i32
    %c0_i32_1 = arith.constant 0 : i32
    return %c0_i32, %c0_i32_0 : i32, i32
  }
  func.func @transform_4(%arg0: i32, %arg1: i32) -> (i32, i32, i32) {
    %c0_i32 = arith.constant 0 : i32
    %c0_i32_0 = arith.constant 0 : i32
    return %arg0, %arg1, %c0_i32 : i32, i32, i32
  }
  func.func @transform_5(%arg0: i32, %arg1: i32) -> (i32, i32, i32) {
    %c0_i32 = arith.constant 0 : i32
    %c0_i32_0 = arith.constant 0 : i32
    return %arg0, %arg1, %c0_i32 : i32, i32, i32
  }
  func.func @transform_6(%arg0: i32, %arg1: i32) -> (i32, i32, i32) {
    %c0_i32 = arith.constant 0 : i32
    %c0_i32_0 = arith.constant 0 : i32
    return %arg0, %arg1, %c0_i32 : i32, i32, i32
  }
}

module attributes {stable_mosaic.version = 11 : i64} {
  func.func @_qkv_kernel(%arg0: i32, %arg1: i32, %arg2: memref<1x8x128xf32, #tpu.memory_space<vmem>>, %arg3: memref<1x128xf32, #tpu.memory_space<vmem>>, %arg4: memref<1x128xf32, #tpu.memory_space<vmem>>, %arg5: memref<128x384xbf16, #tpu.memory_space<vmem>>, %arg6: memref<1x8x384xf32, #tpu.memory_space<vmem>>, %arg7: memref<1x8x128xbf16, #tpu.memory_space<vmem>>, %arg8: memref<1x8x256xbf16, #tpu.memory_space<vmem>>) attributes {dimension_semantics = [#tpu.dimension_semantics<parallel>, #tpu.dimension_semantics<parallel>], iteration_bounds = array<i64: 2, 2>, scalar_prefetch = 0 : i64, scratch_operands = 0 : i64, tpu.core_type = #tpu.core_type<tc>, window_params = [{transform_indices = @transform_0, window_bounds = array<i64: 1, 8, 128>}, {pipeline_mode = #tpu.pipeline_mode<synchronous>, transform_indices = @transform_1, window_bounds = array<i64: 1, 128>}, {pipeline_mode = #tpu.pipeline_mode<synchronous>, transform_indices = @transform_2, window_bounds = array<i64: 1, 128>}, {pipeline_mode = #tpu.pipeline_mode<synchronous>, transform_indices = @transform_3, window_bounds = array<i64: 128, 384>}, {transform_indices = @transform_4, window_bounds = array<i64: 1, 8, 384>}, {transform_indices = @transform_5, window_bounds = array<i64: 1, 8, 128>}, {transform_indices = @transform_6, window_bounds = array<i64: 1, 8, 256>}]} {
    %c0 = arith.constant 0 : index
    %c0_0 = arith.constant 0 : index
    %c0_1 = arith.constant 0 : index
    %0 = vector.load %arg2[%c0, %c0_0, %c0_1] : memref<1x8x128xf32, #tpu.memory_space<vmem>>, vector<1x8x128xf32>
    %1 = vector.shape_cast %0 : vector<1x8x128xf32> to vector<8x128xf32>
    %c0_2 = arith.constant 0 : index
    %c0_3 = arith.constant 0 : index
    %2 = vector.load %arg3[%c0_2, %c0_3] : memref<1x128xf32, #tpu.memory_space<vmem>>, vector<1x128xf32>
    %3 = vector.shape_cast %2 : vector<1x128xf32> to vector<128xf32>
    %c0_4 = arith.constant 0 : index
    %c0_5 = arith.constant 0 : index
    %4 = vector.load %arg4[%c0_4, %c0_5] : memref<1x128xf32, #tpu.memory_space<vmem>>, vector<1x128xf32>
    %5 = vector.shape_cast %4 : vector<1x128xf32> to vector<128xf32>
    %cst = arith.constant dense<0.000000e+00> : vector<8xf32>
    %6 = vector.multi_reduction <add>, %1, %cst [1] : vector<8x128xf32> to vector<8xf32>
    %7 = vector.shape_cast %6 : vector<8xf32> to vector<8x1xf32>
    %cst_6 = arith.constant 1.280000e+02 : f32
    %8 = vector.broadcast %cst_6 : f32 to vector<8x1xf32>
    %9 = arith.divf %7, %8 : vector<8x1xf32>
    %10 = vector.broadcast %9 : vector<8x1xf32> to vector<8x128xf32>
    %11 = arith.subf %1, %10 : vector<8x128xf32>
    %12 = arith.mulf %11, %11 : vector<8x128xf32>
    %cst_7 = arith.constant dense<0.000000e+00> : vector<8xf32>
    %13 = vector.multi_reduction <add>, %12, %cst_7 [1] : vector<8x128xf32> to vector<8xf32>
    %14 = vector.shape_cast %13 : vector<8xf32> to vector<8x1xf32>
    %cst_8 = arith.constant 1.280000e+02 : f32
    %15 = vector.broadcast %cst_8 : f32 to vector<8x1xf32>
    %16 = arith.divf %14, %15 : vector<8x1xf32>
    %17 = vector.broadcast %9 : vector<8x1xf32> to vector<8x128xf32>
    %18 = arith.subf %1, %17 : vector<8x128xf32>
    %cst_9 = arith.constant 9.99999974E-6 : f32
    %19 = vector.broadcast %cst_9 : f32 to vector<8x1xf32>
    %20 = arith.addf %16, %19 : vector<8x1xf32>
    %21 = math.rsqrt %20 : vector<8x1xf32>
    %22 = vector.broadcast %21 : vector<8x1xf32> to vector<8x128xf32>
    %23 = arith.mulf %18, %22 : vector<8x128xf32>
    %24 = vector.shape_cast %3 : vector<128xf32> to vector<1x128xf32>
    %25 = vector.broadcast %24 : vector<1x128xf32> to vector<8x128xf32>
    %26 = arith.mulf %23, %25 : vector<8x128xf32>
    %27 = vector.shape_cast %5 : vector<128xf32> to vector<1x128xf32>
    %28 = vector.broadcast %27 : vector<1x128xf32> to vector<8x128xf32>
    %29 = arith.addf %26, %28 : vector<8x128xf32>
    %30 = arith.truncf %29 : vector<8x128xf32> to vector<8x128xbf16>
    %c0_10 = arith.constant 0 : index
    %c0_11 = arith.constant 0 : index
    %31 = vector.load %arg5[%c0_10, %c0_11] : memref<128x384xbf16, #tpu.memory_space<vmem>>, vector<128x384xbf16>
    %cst_12 = arith.constant dense<0.000000e+00> : vector<8x384xf32>
    %32 = tpu.matmul %30, %31, %cst_12 {dimension_numbers = #tpu.dot_dimension_numbers<[1], [0], [0], [1], [0, 0, 1, 1], [], []>} : vector<8x128xbf16>, vector<128x384xbf16>, vector<8x384xf32> -> vector<8x384xf32>
    %c0_13 = arith.constant 0 : index
    %c0_14 = arith.constant 0 : index
    %c0_15 = arith.constant 0 : index
    %33 = vector.load %arg6[%c0_13, %c0_14, %c0_15] : memref<1x8x384xf32, #tpu.memory_space<vmem>>, vector<1x8x384xf32>
    %34 = vector.shape_cast %33 : vector<1x8x384xf32> to vector<8x384xf32>
    %35 = vector.shape_cast %32 : vector<8x384xf32> to vector<1x8x384xf32>
    tpu.vector_store %arg6[%c0_13, %c0_14, %c0_15], %35 {strides = array<i32>} : memref<1x8x384xf32, #tpu.memory_space<vmem>>, vector<1x8x384xf32>,
    %36 = vector.extract_strided_slice %32 {offsets = [0, 0], sizes = [8, 128], strides = [1, 1]} : vector<8x384xf32> to vector<8x128xf32>
    %cst_16 = arith.constant 0.176776692 : f32
    %37 = vector.broadcast %cst_16 : f32 to vector<8x128xf32>
    %38 = arith.mulf %36, %37 : vector<8x128xf32>
    %39 = arith.truncf %38 : vector<8x128xf32> to vector<8x128xbf16>
    %c0_17 = arith.constant 0 : index
    %c0_18 = arith.constant 0 : index
    %c0_19 = arith.constant 0 : index
    %40 = vector.load %arg7[%c0_17, %c0_18, %c0_19] : memref<1x8x128xbf16, #tpu.memory_space<vmem>>, vector<1x8x128xbf16>
    %41 = vector.shape_cast %40 : vector<1x8x128xbf16> to vector<8x128xbf16>
    %42 = vector.shape_cast %39 : vector<8x128xbf16> to vector<1x8x128xbf16>
    tpu.vector_store %arg7[%c0_17, %c0_18, %c0_19], %42 {strides = array<i32>} : memref<1x8x128xbf16, #tpu.memory_space<vmem>>, vector<1x8x128xbf16>,
    %43 = vector.extract_strided_slice %32 {offsets = [0, 128], sizes = [8, 256], strides = [1, 1]} : vector<8x384xf32> to vector<8x256xf32>
    %44 = arith.truncf %43 : vector<8x256xf32> to vector<8x256xbf16>
    %c0_20 = arith.constant 0 : index
    %c0_21 = arith.constant 0 : index
    %c0_22 = arith.constant 0 : index
    %45 = vector.load %arg8[%c0_20, %c0_21, %c0_22] : memref<1x8x256xbf16, #tpu.memory_space<vmem>>, vector<1x8x256xbf16>
    %46 = vector.shape_cast %45 : vector<1x8x256xbf16> to vector<8x256xbf16>
    %47 = vector.shape_cast %44 : vector<8x256xbf16> to vector<1x8x256xbf16>
    tpu.vector_store %arg8[%c0_20, %c0_21, %c0_22], %47 {strides = array<i32>} : memref<1x8x256xbf16, #tpu.memory_space<vmem>>, vector<1x8x256xbf16>,
    return
  }
  func.func @transform_0(%arg0: i32, %arg1: i32) -> (i32, i32, i32) {
    %c0_i32 = arith.constant 0 : i32
    %c0_i32_0 = arith.constant 0 : i32
    return %arg0, %arg1, %c0_i32 : i32, i32, i32
  }
  func.func @transform_1(%arg0: i32, %arg1: i32) -> (i32, i32) {
    %c0_i32 = arith.constant 0 : i32
    %c0_i32_0 = arith.constant 0 : i32
    %c0_i32_1 = arith.constant 0 : i32
    return %c0_i32, %c0_i32_0 : i32, i32
  }
  func.func @transform_2(%arg0: i32, %arg1: i32) -> (i32, i32) {
    %c0_i32 = arith.constant 0 : i32
    %c0_i32_0 = arith.constant 0 : i32
    %c0_i32_1 = arith.constant 0 : i32
    return %c0_i32, %c0_i32_0 : i32, i32
  }
  func.func @transform_3(%arg0: i32, %arg1: i32) -> (i32, i32) {
    %c0_i32 = arith.constant 0 : i32
    %c0_i32_0 = arith.constant 0 : i32
    %c0_i32_1 = arith.constant 0 : i32
    return %c0_i32, %c0_i32_0 : i32, i32
  }
  func.func @transform_4(%arg0: i32, %arg1: i32) -> (i32, i32, i32) {
    %c0_i32 = arith.constant 0 : i32
    %c0_i32_0 = arith.constant 0 : i32
    return %arg0, %arg1, %c0_i32 : i32, i32, i32
  }
  func.func @transform_5(%arg0: i32, %arg1: i32) -> (i32, i32, i32) {
    %c0_i32 = arith.constant 0 : i32
    %c0_i32_0 = arith.constant 0 : i32
    return %arg0, %arg1, %c0_i32 : i32, i32, i32
  }
  func.func @transform_6(%arg0: i32, %arg1: i32) -> (i32, i32, i32) {
    %c0_i32 = arith.constant 0 : i32
    %c0_i32_0 = arith.constant 0 : i32
    return %arg0, %arg1, %c0_i32 : i32, i32, i32
  }
}

</mosaic_0001>

<bundles_post_ra>
// kernel: tpu_custom_call.1
= control target key start
LH: loop header
LB: loop body
LE: loop exit
PB: predicated region body
PF: predicated region fallthrough
CT: control target
= control target key end

     0   :  { %s1649_s0 = inlined_call_operand.hbm [shape: f32[2,16,128], index: 0, kind: input, shape index: {}]   ;;  %s1650_s1 = inlined_call_operand.vmem [shape: f32[1,128], index: 1, kind: input, shape index: {}]   ;;  %s1651_s2 = inlined_call_operand.vmem [shape: f32[1,128], index: 2, kind: input, shape index: {}]   ;;  %s1652_s3 = inlined_call_operand.hbm [shape: bf16[128,384], index: 3, kind: input, shape index: {}]   ;;  %s1653_s4 = inlined_call_operand.hbm [shape: f32[2,16,384], index: 4, kind: output, shape index: {0}]   ;;  %s1654_s5 = inlined_call_operand.hbm [shape: bf16[2,16,128], index: 5, kind: output, shape index: {1}]   ;;  %s1655_s6 = inlined_call_operand.hbm [shape: bf16[2,16,256], index: 6, kind: output, shape index: {2}]  }
   0x1   :  { %1668 = sst [smem:[#allocation19_spill]] %s1649_s0 }
   0x2   :  { %1669 = sst [smem:[#allocation20_spill]] %s1652_s3 }
   0x3   :  { %1670 = sst [smem:[#allocation21_spill]] %s1654_s5 }
   0x4   :  { %1671 = sst [smem:[#allocation22_spill]] %s1655_s6 }
   0x5   :  { %12 = vsyncpa [#allocation3], 0 }
   0x6   :  { %14 = vsyncpa [#allocation3 + $0x1], 0 }
   0x7   :  { %15 = vsyncpa [#allocation6], 0 }
   0x8   :  { %16 = vsyncpa [#allocation4], 0 }
   0x9   :  { %18 = vsyncpa [#allocation4 + $0x1], 0 }
   0xa   :  { %19 = vsyncpa [#allocation9], 0 }
   0xb   :  { %21 = vsyncpa [#allocation9 + $0x1], 0  ;;  %s1317_s21 = smov 0   ;;  %s1319_s22 = smov 0  }
   0xc   :  { %s1321_s23 = smov 0   ;;  %s1323_s24 = smov 0  }
   0xd   :  { %s1325_s25 = smov 0   ;;  %s1327_s26 = smov 0  }
   0xe   :  { %s1329_s27 = smov 0   ;;  %s1331_s28 = smov 0  }
   0xf LB: > { %1672 = sst [smem:[#allocation15_spill]] %s1242_s21  ;;  %s1358_s29 = sadd.s32 4294967295, %s1270_s28   ;;  %s1270_s28 = sphi %s1331_s28, %s27_s28   ;;  %s1266_s27 = sphi %s1329_s27, %s1706_s27   ;;  %s1262_s26 = sphi %s1327_s26, %s1705_s26   ;;  %s1258_s25 = sphi %s1325_s25, %s1704_s25   ;;  %s1254_s24 = sphi %s1323_s24, %s1703_s24   ;;  %s1250_s23 = sphi %s1321_s23, %s1702_s23   ;;  %s1246_s22 = sphi %s1319_s22, %s1701_s22   ;;  %s1242_s21 = sphi %s1317_s21, %s1700_s21  }
  0x10   : > { %s1659_s30 = sadd.s32 4294967294, %s1270_s28   ;;  %p61_p0 = scmp.ne.s32.totalorder %s1246_s22, %s1242_s21 }
  0x11   : > { %p1656_p1 = scmp.eq.s32.totalorder %s1358_s29, 0  ;;  %p156_p3 = scmp.eq.s32.totalorder %s1659_s30, 3 }
  0x12   : > { %p831_p5 = scmp.ge.s32.totalorder %s1270_s28, 1  ;;  %p219_p7 = scmp.lt.s32.totalorder %s1270_s28, 5 }
  0x13   : > { %p1369_p4 = por %p1656_p1, %p61_p0  ;;  %p1374_p6 = por %p156_p3, %p61_p0 }
  0x14   : > { %p1379_p8 = pnand %p831_p5, %p219_p7  ;;  %s1272_s10 = smov [#allocation5]  }
  0x15   : > { %s1673_s7 = scalar_select %p1369_p4, 1, 0 }
  0x16   : > { %s1674_s8 = scalar_select %p1374_p6, 1, 0 }
  0x17   : > { %s1676_s9 = scalar_select %p1379_p8, 1, 0 }
  0x18   : > { %1675 = sst [smem:[#allocation16_spill]] %s1674_s8  ;;  %s237_s11 = sshll.u32 %s1272_s10, 4  ;;  %s238_s11 = int_to_ptr.vmem [resolvable:$true] %s237_s11 }
  0x19   : > { %p924_p9 = pneg %p1379_p8  ;;  %s1678_s3 = sld [smem:[#allocation20_spill]] }
  0x1b   : > { %p1387_p10 = pnand %p924_p9, %p1656_p1 }
  0x1d   : > { %p1052_p12 = pneg %p1387_p10 }
  0x1f   : > { %s1050_s15 = scalar_lea.hbm %s1678_s3, 3072 }
  0x20   : > { %p1051_p11 = scmp.ne.s32.totalorder %s1678_s3, %s1050_s15  ;;  %p1057_p3 = scmp.lt.u32.totalorder %s1050_s15, %s1678_s3 }
  0x22   : > { %p1053_p13 = pnand %p1052_p12, %p1051_p11 }
  0x24   : > { %p1054_p0 = pneg %p1053_p13 }
  0x26   : > { %p1059_p5 = pnand %p1057_p3, %p1054_p0 }
  0x28   : > { %1062 = shalt.err (!%p1059_p5)
}
  0x29   : > { %s1063_s20 = scalar_lea.vmem %s238_s11, 3072  ;;  %p1071_p2 = scmp.lt.s32.totalorder %s238_s11, %s238_s11 }
  0x2a   : > { %p1064_p7 = scmp.ne.s32.totalorder %s238_s11, %s1063_s20  ;;  %p1072_p6 = scmp.lt.s32.totalorder %s1063_s20, %s1063_s20 }
  0x2c   : > { %p1066_p9 = pnand %p1064_p7, %p1052_p12  ;;  %p1073_p4 = por %p1072_p6, %p1071_p2 }
  0x2e   : > { %p1067_p1 = pneg %p1066_p9 }
  0x30   : > { %p1074_p8 = pnand %p1073_p4, %p1067_p1 }
  0x32   : > { %1077 = shalt.err (!%p1074_p8)
}
  0x33   : > { %s1273_s10 = smov 192   ;;  %s1274_s13 = smov 12  }
  0x34   : > { %927 = dma.hbm_to_vmem [thread:$0]  (!%p1387_p10), %s1678_s3, 3072, %s238_s11, [#allocation6], %s1273_s10, %s1273_s10, %s1274_s13  }
  0x35   : > { %s36_s16 = sadd.s32 1, %s1262_s26  ;;  %s39_s17 = sadd.s32 1, %s1266_s27 }
  0x36   : > { %p37_p1 = scmp.ge.s32.totalorder %s36_s16, 2  ;;  %s48_s18 = sadd.s32 1, %s1250_s23 }
  0x37   : > { %p55_p2 = scmp.ne.s32.totalorder %s1250_s23, %s1246_s22  ;;  %p56_p4 = scmp.eq.s32.totalorder %s1270_s28, 0 }
  0x38   : > { %s1708_s16 = smov (%p37_p1, %s36_s16), 0  ;;  %s1710_s17 = smov (!%p37_p1, %s39_s17), %s1266_s27 }
  0x39   : > { %1679 = sst [smem:[#allocation17_spill]] %s1708_s16  ;;  %s44_s19 = ssub.s32 %s1262_s26, %s1708_s16 }
  0x3a   : > { %p41_p6 = scmp.ge.s32.totalorder %s1710_s17, 2  ;;  %p1680_p8 = scmp.eq.s32.totalorder %s1358_s29, 3 }
  0x3b   : > { %p1424_p10 = por %p56_p4, %p55_p2  ;;  %p943_p12 = scmp.lt.s32.totalorder %s1270_s28, 4 }
  0x3c   : > { %p1420_p11 = por %p1680_p8, %p55_p2  ;;  %s1712_s17 = smov (%p41_p6, %s1710_s17), 0 }
  0x3d   : > { %s251_s20 = sand.u32 1, %s1250_s23   ;;  %s835_s10 = sshll.u32 %s1266_s27, 1 }
  0x3e   : > { %s1681_s12 = scalar_select %p1420_p11, 1, 0 }
  0x3f   : > { %s43_s13 = ssub.s32 %s1266_s27, %s1712_s17  ;;  %s834_s15 = sshll.u32 %s251_s20, 3 }
  0x40   : > { %1682 = sst [smem:[#allocation18_spill]] %s1681_s12  ;;  %s45_s14 = sor.u32 %s44_s19, %s43_s13 }
  0x41   : > { %p46_p13 = scmp.eq.s32.totalorder %s45_s14, 0  ;;  %s260_s30 = sadd.s32 %s1262_s26, %s835_s10 }
  0x42   : > { %s255_s3 = scalar_lea.vmem [#allocation2], %s834_s15  ;;  %s836_s21 = sshll.u32 %s260_s30, 7 }
  0x43   : > { %s264_s16 = sshll.u32 %s255_s3, 4  ;;  %s1684_s0 = sld [smem:[#allocation19_spill]]  ;;  %s1439_s16 = int_to_ptr.vmem [resolvable:$true] %s264_s16 }
  0x44   : > { %s1437_s8 = scalar_select %p46_p13, %s1250_s23, %s48_s18  }
  0x45   : > { %p1450_p0 = pnand %p943_p12, %p1424_p10  ;;  %s252_s3 = scalar_lea.sflag [#allocation3], %s251_s20 }
  0x47   : > { %p1080_p5 = pneg %p1450_p0 }
  0x49   : > { %s1444_s12 = scalar_lea.hbm %s1684_s0, %s836_s21  ;;  %s1083_s21 = scalar_lea.hbm %s1684_s0, 512 }
  0x4a   : > { %s1078_s30 = scalar_lea.hbm %s1444_s12, 128  ;;  %p1084_p1 = scmp.lt.u32.totalorder %s1444_s12, %s1684_s0 }
  0x4b   : > { %p1079_p3 = scmp.ne.s32.totalorder %s1444_s12, %s1078_s30  ;;  %p1085_p2 = scmp.lt.u32.totalorder %s1083_s21, %s1078_s30 }
  0x4c   : > { %p1087_p6 = scmp.lt.u32.totalorder %s1078_s30, %s1444_s12 }
  0x4d   : > { %p1081_p7 = pnand %p1080_p5, %p1079_p3  ;;  %p1086_p4 = por %p1085_p2, %p1084_p1 }
  0x4f   : > { %p1082_p9 = pneg %p1081_p7  ;;  %p1088_p8 = por %p1087_p6, %p1086_p4 }
  0x51   : > { %p1089_p10 = pnand %p1088_p8, %p1082_p9 }
  0x53   : > { %1092 = shalt.err (!%p1089_p10)
}
  0x54   : > { %s1093_s20 = scalar_lea.vmem %s1439_s16, 128  ;;  %s1275_s10 = smov [#allocation2]  }
  0x55   : > { %p1094_p12 = scmp.ne.s32.totalorder %s1439_s16, %s1093_s20  ;;  %s1098_s13 = sshll.u32 %s1275_s10, 4  ;;  %s1099_s13 = int_to_ptr.vmem [resolvable:$false] %s1098_s13 }
  0x56   : > { %s1100_s14 = scalar_lea.vmem %s1099_s13, 256  ;;  %p1101_p7 = scmp.lt.s32.totalorder %s1439_s16, %s1099_s13 }
  0x57   : > { %p1096_p13 = pnand %p1094_p12, %p1080_p5  ;;  %p1102_p1 = scmp.lt.s32.totalorder %s1100_s14, %s1093_s20 }
  0x59   : > { %p1097_p3 = pneg %p1096_p13  ;;  %p1103_p2 = por %p1102_p1, %p1101_p7 }
  0x5b   : > { %p1104_p4 = pnand %p1103_p2, %p1097_p3 }
  0x5d   : > { %1107 = shalt.err (!%p1104_p4)
}
  0x5e   : > { %931 = dma.hbm_to_vmem [thread:$0]  (!%p1450_p0), %s1444_s12, 128, %s1439_s16, %s252_s3  }
  0x5f   : > { %p1686_p9 = scmp.ne.s32.totalorder %s1676_s9, 0 }
  0x60   : > { %s1482_s15 = sand.u32 (!%p1686_p9), 1, %s1246_s22   ;;  %p1687_p5 = scmp.ne.s32.totalorder (!%p1686_p9), %s1673_s7, 0 }
  0x61   : > { %273 = sbr.rel (%p1686_p9) target bundleno = 703 (0x2bf), region = 36  ;;  %s1667_s30 = sshll.u32 (!%p1686_p9), %s1482_s15, 3 }
  0x62   : > { %s276_s5 = scalar_lea.sflag (!%p1686_p9), [#allocation3], %s1482_s15  ;;  %s279_s6 = scalar_lea.vmem (!%p1686_p9), [#allocation2], %s1667_s30 }
  0x68   : > { %1225 = dma.done.wait (%p1687_p5), %s276_s5, 128  }
  0x69   : > { %1227 = vsyncadd (%p1687_p5), %s276_s5, 4294967168  ;;  %p1688_p0 = scmp.eq.s32.totalorder %s1358_s29, 0 }
  0x6b   : > { %1229 = dma.done.wait (%p1688_p0), [#allocation6], 3072   ;;  %p1689_p6 = pmov %p1688_p0 }
  0x6c   : > { %v323_v0 = vld [vmem:[%s279_s6] sm:$0xff]  ;;  %v1018_v2 = vld [vmem:[#allocation5] ss:$12 sps:$4 sm:$0xff]   ;;  %v1276_v3 = vmov 0.0   ;;  %v1277_v25 = vmov 0   ;;  %vm1278_vm0 = vmmov 0  }
  0x6d   : > { %1231 = vsyncadd (%p1689_p6), [#allocation6], 4294964224  ;;  %326 = vadd.xlane.f32.xlu0 %v323_v0  ;;  %v1016_v1 = vld [vmem:[#allocation5 + $0x4] ss:$12 sps:$4 sm:$0xff]   ;;  %889 = vmatprep.subr.bf16.mxu1 %v1276_v3  ;;  %v1019_v4 = vld [vmem:[#allocation5 + $0x8] ss:$12 sps:$4 sm:$0xff]  }
  0x6e   : > { %v1020_v5 = vld [vmem:[#allocation5 + $0x1c] ss:$12 sps:$4 sm:$0xff]   ;;  %513 = vmatprep.subr.bf16.mxu0 %v1016_v1  ;;  %890 = vmatpush3.bf16.msra.mxu1 %v1019_v4  ;;  %v1022_v6 = vld [vmem:[#allocation5 + $0x18] ss:$12 sps:$4 sm:$0xff]   ;;  %v1023_v7 = vld [vmem:[#allocation5 + $0x20] ss:$12 sps:$4 sm:$0xff]  }
  0x6f   : > { %514 = vmatpush1.bf16.msra.mxu0 %v1018_v2  ;;  %891 = vmatprep.subr.bf16.mxu1 %v1276_v3  ;;  %v1024_v8 = vld [vmem:[#allocation5 + $0x34] ss:$12 sps:$4 sm:$0xff]   ;;  %v1026_v13 = vld [vmem:[#allocation5 + $0x30] ss:$12 sps:$4 sm:$0xff]   ;;  %v1027_v14 = vld [vmem:[#allocation5 + $0x38] ss:$12 sps:$4 sm:$0xff]  }
  0x70   : > { %515 = vmatprep.subr.bf16.mxu0 %v1020_v5  ;;  %v1028_v15 = vld [vmem:[#allocation5 + $0x4c] ss:$12 sps:$4 sm:$0xff]   ;;  %v1030_v16 = vld [vmem:[#allocation5 + $0x48] ss:$12 sps:$4 sm:$0xff]   ;;  %v1031_v17 = vld [vmem:[#allocation5 + $0x50] ss:$12 sps:$4 sm:$0xff]   ;;  %545 = vmatprep.mubr.bf16.mxu0 %v1277_v25 }
  0x71   : > { %v1032_v18 = vld [vmem:[#allocation5 + $0x64] ss:$12 sps:$4 sm:$0xff]   ;;  %v1034_v19 = vld [vmem:[#allocation5 + $0x60] ss:$12 sps:$4 sm:$0xff]   ;;  %v1035_v20 = vld [vmem:[#allocation5 + $0x68] ss:$12 sps:$4 sm:$0xff]   ;;  %905 = vmatprep.mubr.msk.bf16.mxu1 %vm1278_vm0, %v1276_v3 }
  0x72   : > { %892 = vmatpush3.bf16.msra.mxu1 %v1023_v7  ;;  %v1036_v21 = vld [vmem:[#allocation5 + $0x7c] ss:$12 sps:$4 sm:$0xff]   ;;  %v1038_v22 = vld [vmem:[#allocation5 + $0x78] ss:$12 sps:$4 sm:$0xff]   ;;  %v1039_v23 = vld [vmem:[#allocation5 + $0x80] ss:$12 sps:$4 sm:$0xff]  }
  0x73   : > { %516 = vmatpush1.bf16.msra.mxu0 %v1022_v6  ;;  %893 = vmatprep.subr.bf16.mxu1 %v1276_v3  ;;  %v1040_v24 = vld [vmem:[#allocation5 + $0x94] ss:$12 sps:$4 sm:$0xff]   ;;  %v1042_v26 = vld [vmem:[#allocation5 + $0x90] ss:$12 sps:$4 sm:$0xff]   ;;  %v1043_v27 = vld [vmem:[#allocation5 + $0x98] ss:$12 sps:$4 sm:$0xff]  }
  0x74   : > { %517 = vmatprep.subr.bf16.mxu0 %v1024_v8  ;;  %v1044_v28 = vld [vmem:[#allocation5 + $0xac] ss:$12 sps:$4 sm:$0xff]   ;;  %v1046_v29 = vld [vmem:[#allocation5 + $0xa8] ss:$12 sps:$4 sm:$0xff]   ;;  %v1047_v30 = vld [vmem:[#allocation5 + $0xb0] ss:$12 sps:$4 sm:$0xff]  }
  0x75   : > { %v842_v35 = vld [vmem:[%s1650_s1] ss:$0 sm:$0xff]  ;;  %s909_s19 = smul.u32 24, %s1482_s15  ;;  %s840_s18 = sshll.u32 %s1482_s15, 2 }
  0x76   : > { %894 = vmatpush3.bf16.msra.mxu1 %v1027_v14  ;;  %v843_v37 = vld [vmem:[%s1651_s2] ss:$0 sm:$0xff]  ;;  %s910_s3 = smul.u32 3, %s1254_s24  ;;  %s872_s11 = sshll.u32 %s1258_s25, 1 }
  0x77   : > { %518 = vmatpush1.bf16.msra.mxu0 %v1026_v13  ;;  %895 = vmatprep.subr.bf16.mxu1 %v1276_v3  ;;  %s911_s21 = smul.u32 6, %s1258_s25  ;;  %s307_s20 = scalar_lea.vmem [#allocation7], %s909_s19 }
  0x78   : > { %519 = vmatprep.subr.bf16.mxu0 %v1028_v15  ;;  %s636_s10 = sshll.u32 %s307_s20, 4  ;;  %s874_s5 = sshll.u32 %s1254_s24, 1  ;;  %s1511_s10 = int_to_ptr.vmem [resolvable:$true] %s636_s10 }
  0x79   : > { %s632_s14 = sadd.s32 %s911_s21, %s910_s3  ;;  %s875_s6 = sshll.u32 %s1258_s25, 2 }
  0x7a   : > { %896 = vmatpush3.bf16.msra.mxu1 %v1031_v17  ;;  %s647_s7 = sadd.s32 %s1254_s24, %s872_s11  ;;  %s871_s9 = sshll.u32 %s632_s14, 7 }
  0x7b   : > { %520 = vmatpush1.bf16.msra.mxu0 %v1030_v16  ;;  %897 = vmatprep.subr.bf16.mxu1 %v1276_v3  ;;  %s1513_s16 = sadd.s32 %s875_s6, %s874_s5  ;;  %s873_s12 = sshll.u32 %s647_s7, 6 }
  0x7c   : > { %521 = vmatprep.subr.bf16.mxu0 %v1032_v18  ;;  %s1515_s30 = scalar_lea.vmem [#allocation8], %s840_s18  ;;  %s1521_s3 = scalar_lea.hbm %s1653_s4, %s871_s9 }
  0x7d   : > { %s651_s0 = sshll.u32 %s1515_s30, 4  ;;  %s876_s25 = sshll.u32 %s1513_s16, 6  ;;  %s1534_s0 = int_to_ptr.vmem [resolvable:$true] %s651_s0 }
  0x7e   : > { %898 = vmatpush3.bf16.msra.mxu1 %v1035_v20  ;;  %s1691_s21 = sshll.u32 %s1482_s15, 3  ;;  %s1692_s5 = sld [smem:[#allocation21_spill]] }
  0x7f   : > { %522 = vmatpush1.bf16.msra.mxu0 %v1034_v19  ;;  %899 = vmatprep.subr.bf16.mxu1 %v1276_v3  ;;  %s1526_s18 = scalar_lea.vmem [#allocation10], %s1691_s21  ;;  %s610_s7 = scalar_lea.sflag [#allocation4], %s1482_s15 }
  0x80   : > { %523 = vmatprep.subr.bf16.mxu0 %v1036_v21  ;;  %s667_s11 = sshll.u32 %s1526_s18, 4  ;;  %s1108_s9 = scalar_lea.vmem %s1511_s10, 384  ;;  %s1568_s11 = int_to_ptr.vmem [resolvable:$true] %s667_s11 }
  0x81   : > { %p1109_p8 = scmp.ne.s32.totalorder %s1511_s10, %s1108_s9 }
  0x82   : > { %900 = vmatpush3.bf16.msra.mxu1 %v1039_v23 }
  0x83   : > { %524 = vmatpush1.bf16.msra.mxu0 %v1038_v22  ;;  %901 = vmatprep.subr.bf16.mxu1 %v1276_v3  ;;  %p1110_p10 = pnand %p1109_p8, %p1420_p11 }
  0x84   : > { %525 = vmatprep.subr.bf16.mxu0 %v1040_v24  ;;  %s1532_s6 = scalar_lea.hbm %s1692_s5, %s873_s12 }
  0x85   : > { %p1111_p12 = pneg %p1110_p10 }
  0x86   : > { %902 = vmatpush3.bf16.msra.mxu1 %v1043_v27 }
  0x87   : > { %526 = vmatpush1.bf16.msra.mxu0 %v1042_v26  ;;  %903 = vmatprep.subr.bf16.mxu1 %v1276_v3 }
  0x88   : > { %527 = vmatprep.subr.bf16.mxu0 %v1044_v28 }
  0x8a   : > { %904 = vmatpush3.bf16.msra.mxu1 %v1047_v30 }
  0x8b   : > { %528 = vmatpush1.bf16.msra.mxu0 %v1046_v29 }
  0xfa   : > { %v327_v9 = vpop.xlane.xlu0 %326 }
  0xfb   : > { %v329_v10 = vmul.f32 0.0078125, %v327_v9 }
  0xfd   : > { %v330_v11 = vsub.f32 %v323_v0, %v329_v10 }
  0xff   : > { %v331_v12 = vmul.f32 %v330_v11, %v330_v11 }
 0x101   : > { %332 = vadd.xlane.f32.xlu0 %v331_v12 }
 0x18e   : > { %v333_v31 = vpop.xlane.xlu0 %332 }
 0x18f   : > { %v334_v32 = vmul.f32 0.0078125, %v333_v31 }
 0x191   : > { %v335_v33 = vadd.f32 1e-05, %v334_v32 }
 0x193   : > { %1048 = vrsqrt.f32 %v335_v33 }
 0x19d   : > { %v1049_v34 = vpop.eup %1048 }
 0x19e   : > { %v337_v36 = vmul.f32 %v1049_v34, %v330_v11 }
 0x1a0   : > { %v344_v38 = vmul.f32 %v842_v35, %v337_v36 }
 0x1a2   : > { %v351_v39 = vadd.f32 %v843_v37, %v344_v38 }
 0x1a4   : > { %v352_v40 = vpack.c.bf16 %v351_v39, %v351_v39 }
 0x1a6   : > { %546 = vmatmul.mubr.bf16.vlgmr.msra.gmra.mrb[0].mxu0 %v352_v40  ;;  %906 = vmatmul.mubr.bf16.vlgmr.msra.gmra.mrb[0].mxu1 %v352_v40 }
 0x279   : > { %v547_v41 = vpop.f32.mrb[0].mxu0  ;;  %v588_v42 = vpop.f32.mrb[0].mxu1 }
 0x27a   : > { %594 = vst [vmem:[%s307_s20] sm:$0xff] %v547_v41  ;;  %v597_v43 = vmul.f32 0.17677669, %v547_v41  ;;  %596 = vst [vmem:[%s307_s20 + $0x10] sm:$0xff] %v588_v42  ;;  %v549_v44 = vpop.f32.mrb[1].mxu0  ;;  %v907_v45 = vpop.f32.mrb[1].mxu1 }
 0x27b   : > { %595 = vst [vmem:[%s307_s20 + $0x8] sm:$0xff] %v549_v44  ;;  %v879_v46 = vpack.c.bf16 %v588_v42, %v549_v44  ;;  %v551_v47 = vpop.f32.mrb[2].mxu0  ;;  %v591_v48 = vpop.f32.mrb[2].mxu1  ;;  %s1279_s20 = smov [#allocation7]  }
 0x27c   : > { %v598_v49 = vpack.c.bf16 %v597_v43, %v597_v43  ;;  %v552_v50 = vpop.f32.mrb[3].mxu0  ;;  %v908_v51 = vpop.f32.mrb[3].mxu1  ;;  %s1112_s19 = sshll.u32 %s1279_s20, 4  ;;  %s1113_s19 = int_to_ptr.vmem [resolvable:$false] %s1112_s19 }
 0x27d   : > { %s1114_s21 = scalar_lea.vmem %s1113_s19, 768  ;;  %p1115_p13 = scmp.lt.s32.totalorder %s1511_s10, %s1113_s19 }
 0x27e   : > { %p1116_p3 = scmp.lt.s32.totalorder %s1114_s21, %s1108_s9 }
 0x280   : > { %p1117_p7 = por %p1116_p3, %p1115_p13 }
 0x282   : > { %p1118_p1 = pnand %p1117_p7, %p1111_p12 }
 0x284   : > { %1121 = shalt.err (!%p1118_p1)
}
 0x285   : > { %s1122_s15 = scalar_lea.hbm %s1521_s3, 384  ;;  %s1126_s14 = scalar_lea.hbm %s1653_s4, 1536 }
 0x286   : > { %p1123_p2 = scmp.ne.s32.totalorder %s1521_s3, %s1122_s15  ;;  %p1127_p5 = scmp.lt.u32.totalorder %s1521_s3, %s1653_s4 }
 0x287   : > { %p1128_p0 = scmp.lt.u32.totalorder %s1126_s14, %s1122_s15  ;;  %p1130_p8 = scmp.lt.u32.totalorder %s1122_s15, %s1521_s3 }
 0x288   : > { %p1124_p4 = pnand %p1123_p2, %p1420_p11 }
 0x289   : > { %p1129_p6 = por %p1128_p0, %p1127_p5 }
 0x28a   : > { %p1125_p9 = pneg %p1124_p4 }
 0x28b   : > { %p1131_p10 = por %p1130_p8, %p1129_p6 }
 0x28d   : > { %p1132_p12 = pnand %p1131_p10, %p1125_p9 }
 0x28f   : > { %1135 = shalt.err (!%p1132_p12)
}
 0x290   : > { %918 = dma.vmem_to_hbm [thread:$0]  (%p1420_p11), %s1511_s10, 384, %s1521_s3, %s610_s7   ;;  %608 = vst [vmem:[%s1526_s18] sm:$0xff] %v879_v46  ;;  %599 = vst [vmem:[%s1515_s30] sm:$0xf] %v598_v49 }
 0x291   : > { %s1693_s15 = sld [smem:[#allocation22_spill]]  ;;  %s1694_s13 = sand.u32 1, %s1358_s29  }
 0x292   : > { %s1573_s14 = scalar_lea.sflag [#allocation9], %s1694_s13  ;;  %s1136_s20 = scalar_lea.vmem %s1534_s0, 64 }
 0x293   : > { %p1137_p13 = scmp.ne.s32.totalorder %s1534_s0, %s1136_s20  ;;  %s1280_s10 = smov [#allocation8]  }
 0x294   : > { %s1140_s3 = sshll.u32 %s1280_s10, 4  ;;  %s1141_s3 = int_to_ptr.vmem [resolvable:$false] %s1140_s3 }
 0x295   : > { %p1138_p3 = pnand %p1137_p13, %p1420_p11  ;;  %s1142_s16 = scalar_lea.vmem %s1141_s3, 128 }
 0x296   : > { %p1143_p1 = scmp.lt.s32.totalorder %s1534_s0, %s1141_s3  ;;  %p1144_p2 = scmp.lt.s32.totalorder %s1142_s16, %s1136_s20 }
 0x297   : > { %s1564_s12 = scalar_lea.hbm %s1693_s15, %s876_s25  ;;  %p1139_p7 = pneg %p1138_p3 }
 0x298   : > { %p1145_p4 = por %p1144_p2, %p1143_p1 }
 0x29a   : > { %p1146_p9 = pnand %p1145_p4, %p1139_p7 }
 0x29c   : > { %1149 = shalt.err (!%p1146_p9)
}
 0x29d   : > { %s1150_s29 = scalar_lea.hbm %s1532_s6, 64  ;;  %s1154_s18 = scalar_lea.hbm %s1692_s5, 256 }
 0x29e   : > { %p1151_p5 = scmp.ne.s32.totalorder %s1532_s6, %s1150_s29  ;;  %p1155_p8 = scmp.lt.u32.totalorder %s1532_s6, %s1692_s5 }
 0x29f   : > { %p1156_p10 = scmp.lt.u32.totalorder %s1154_s18, %s1150_s29  ;;  %p1158_p13 = scmp.lt.u32.totalorder %s1150_s29, %s1532_s6 }
 0x2a0   : > { %p1152_p0 = pnand %p1151_p5, %p1420_p11 }
 0x2a1   : > { %p1157_p12 = por %p1156_p10, %p1155_p8 }
 0x2a2   : > { %p1153_p6 = pneg %p1152_p0 }
 0x2a3   : > { %p1159_p3 = por %p1158_p13, %p1157_p12 }
 0x2a5   : > { %p1160_p7 = pnand %p1159_p3, %p1153_p6 }
 0x2a7   : > { %1163 = shalt.err (!%p1160_p7)
}
 0x2a8   : > { %919 = dma.vmem_to_hbm [thread:$0]  (%p1420_p11), %s1534_s0, 64, %s1532_s6, %s1573_s14  }
 0x2a9   : > { %s1164_s9 = scalar_lea.vmem %s1568_s11, 128  ;;  %s1281_s21 = smov [#allocation10]  }
 0x2aa   : > { %p1165_p1 = scmp.ne.s32.totalorder %s1568_s11, %s1164_s9  ;;  %s1168_s13 = sshll.u32 %s1281_s21, 4  ;;  %s1169_s13 = int_to_ptr.vmem [resolvable:$false] %s1168_s13 }
 0x2ab   : > { %s1170_s20 = scalar_lea.vmem %s1169_s13, 256  ;;  %p1171_p9 = scmp.lt.s32.totalorder %s1568_s11, %s1169_s13 }
 0x2ac   : > { %p1166_p2 = pnand %p1165_p1, %p1420_p11  ;;  %p1172_p5 = scmp.lt.s32.totalorder %s1170_s20, %s1164_s9 }
 0x2ae   : > { %p1167_p4 = pneg %p1166_p2  ;;  %p1173_p0 = por %p1172_p5, %p1171_p9 }
 0x2b0   : > { %p1174_p6 = pnand %p1173_p0, %p1167_p4 }
 0x2b2   : > { %1177 = shalt.err (!%p1174_p6)
}
 0x2b3   : > { %s1178_s0 = scalar_lea.hbm %s1564_s12, 128  ;;  %s1182_s3 = scalar_lea.hbm %s1693_s15, 512 }
 0x2b4   : > { %p1179_p8 = scmp.ne.s32.totalorder %s1564_s12, %s1178_s0  ;;  %p1183_p13 = scmp.lt.u32.totalorder %s1564_s12, %s1693_s15 }
 0x2b5   : > { %p1184_p3 = scmp.lt.u32.totalorder %s1182_s3, %s1178_s0  ;;  %p1186_p1 = scmp.lt.u32.totalorder %s1178_s0, %s1564_s12 }
 0x2b6   : > { %p1180_p10 = pnand %p1179_p8, %p1420_p11 }
 0x2b7   : > { %p1185_p7 = por %p1184_p3, %p1183_p13 }
 0x2b8   : > { %p1181_p12 = pneg %p1180_p10 }
 0x2b9   : > { %p1187_p2 = por %p1186_p1, %p1185_p7 }
 0x2bb   : > { %p1188_p4 = pnand %p1187_p2, %p1181_p12 }
 0x2bd   : > { %1191 = shalt.err (!%p1188_p4)
}
 0x2be   : > { %920 = dma.vmem_to_hbm [thread:$0]  (%p1420_p11), %s1568_s11, 128, %s1564_s12, %s1573_s14  }
 0x2bf PF: > { %s1695_s30 = sld [smem:[#allocation15_spill]]  ;;  %s1696_s25 = sld [smem:[#allocation16_spill]] }
 0x2c0   : > { %p945_p9 = scmp.ge.s32.totalorder %s1270_s28, 2 }
 0x2c5   : > { %s679_s18 = sand.u32 1, %s1695_s30   ;;  %p1697_p5 = scmp.ne.s32.totalorder %s1696_s25, 0 }
 0x2c6   : > { %s680_s7 = scalar_lea.sflag [#allocation4], %s679_s18 }
 0x2c7   : > { %p933_p0 = pnand %p945_p9, %p1697_p5 }
 0x2c9   : > { %1233 = dma.done.wait (!%p933_p0), %s680_s7, 384  }
 0x2ca   : > { %1235 = vsyncadd (!%p933_p0), %s680_s7, 4294966912  ;;  %s1698_s19 = sadd.s32 4294967294, %s1270_s28  }
 0x2cb   : > { %s688_s9 = sand.u32 1, %s1698_s19  }
 0x2cc   : > { %s689_s21 = scalar_lea.sflag [#allocation9], %s688_s9 }
 0x2cd   : > { %1237 = dma.done.wait (!%p933_p0), %s689_s21, 192  }
 0x2ce   : > { %1239 = vsyncadd (!%p933_p0), %s689_s21, 4294967104  ;;  %s27_s28 = sadd.s32 1, %s1270_s28   ;;  %s1699_s11 = sld [smem:[#allocation17_spill]] }
 0x2cf   : > { %p24_p11 = scmp.ge.s32.totalorder %s27_s28, 6   ;;  %s1700_s21 = smov %s1246_s22 }
 0x2d0   : > { %s1701_s22 = smov %s1250_s23  ;;  %s1702_s23 = smov %s1437_s8 }
 0x2d1   : > { %s1703_s24 = smov %s1262_s26  ;;  %s1704_s25 = smov %s1266_s27 }
 0x2d2   : > { %s1706_s27 = smov %s1712_s17  ;;  %26 = sbr.rel (!%p24_p11) target bundleno = 15 (0xf), region = 117 }
 0x2d4   : > { %s1705_s26 = smov %s1699_s11 }
 0x2d9   :  { %703 = vsyncpa [#allocation3], 1 }
 0x2da   :  { %705 = vsyncpa [#allocation3 + $0x1], 1 }
 0x2db   :  { %706 = vsyncpa [#allocation6], 1 }
 0x2dc   :  { %707 = vsyncpa [#allocation4], 1 }
 0x2dd   :  { %709 = vsyncpa [#allocation4 + $0x1], 1 }
 0x2de   :  { %710 = vsyncpa [#allocation9], 1 }
 0x2df   :  { %712 = vsyncpa [#allocation9 + $0x1], 1 }

// kernel: tpu_custom_call.1
= control target key start
LH: loop header
LB: loop body
LE: loop exit
PB: predicated region body
PF: predicated region fallthrough
CT: control target
= control target key end

     0   :  { %s1649_s0 = inlined_call_operand.hbm [shape: f32[2,16,128], index: 0, kind: input, shape index: {}]   ;;  %s1650_s1 = inlined_call_operand.vmem [shape: f32[1,128], index: 1, kind: input, shape index: {}]   ;;  %s1651_s2 = inlined_call_operand.vmem [shape: f32[1,128], index: 2, kind: input, shape index: {}]   ;;  %s1652_s3 = inlined_call_operand.hbm [shape: bf16[128,384], index: 3, kind: input, shape index: {}]   ;;  %s1653_s4 = inlined_call_operand.hbm [shape: f32[2,16,384], index: 4, kind: output, shape index: {0}]   ;;  %s1654_s5 = inlined_call_operand.hbm [shape: bf16[2,16,128], index: 5, kind: output, shape index: {1}]   ;;  %s1655_s6 = inlined_call_operand.hbm [shape: bf16[2,16,256], index: 6, kind: output, shape index: {2}]  }
   0x1   :  { %1668 = sst [smem:[#allocation19_spill]] %s1649_s0 }
   0x2   :  { %1669 = sst [smem:[#allocation20_spill]] %s1652_s3 }
   0x3   :  { %1670 = sst [smem:[#allocation21_spill]] %s1654_s5 }
   0x4   :  { %1671 = sst [smem:[#allocation22_spill]] %s1655_s6 }
   0x5   :  { %12 = vsyncpa [#allocation3], 0 }
   0x6   :  { %14 = vsyncpa [#allocation3 + $0x1], 0 }
   0x7   :  { %15 = vsyncpa [#allocation6], 0 }
   0x8   :  { %16 = vsyncpa [#allocation4], 0 }
   0x9   :  { %18 = vsyncpa [#allocation4 + $0x1], 0 }
   0xa   :  { %19 = vsyncpa [#allocation9], 0 }
   0xb   :  { %21 = vsyncpa [#allocation9 + $0x1], 0  ;;  %s1317_s21 = smov 0   ;;  %s1319_s22 = smov 0  }
   0xc   :  { %s1321_s23 = smov 0   ;;  %s1323_s24 = smov 0  }
   0xd   :  { %s1325_s25 = smov 0   ;;  %s1327_s26 = smov 0  }
   0xe   :  { %s1329_s27 = smov 0   ;;  %s1331_s28 = smov 0  }
   0xf LB: > { %1672 = sst [smem:[#allocation15_spill]] %s1242_s21  ;;  %s1358_s29 = sadd.s32 4294967295, %s1270_s28   ;;  %s1270_s28 = sphi %s1331_s28, %s27_s28   ;;  %s1266_s27 = sphi %s1329_s27, %s1706_s27   ;;  %s1262_s26 = sphi %s1327_s26, %s1705_s26   ;;  %s1258_s25 = sphi %s1325_s25, %s1704_s25   ;;  %s1254_s24 = sphi %s1323_s24, %s1703_s24   ;;  %s1250_s23 = sphi %s1321_s23, %s1702_s23   ;;  %s1246_s22 = sphi %s1319_s22, %s1701_s22   ;;  %s1242_s21 = sphi %s1317_s21, %s1700_s21  }
  0x10   : > { %s1659_s30 = sadd.s32 4294967294, %s1270_s28   ;;  %p61_p0 = scmp.ne.s32.totalorder %s1246_s22, %s1242_s21 }
  0x11   : > { %p1656_p1 = scmp.eq.s32.totalorder %s1358_s29, 0  ;;  %p156_p3 = scmp.eq.s32.totalorder %s1659_s30, 3 }
  0x12   : > { %p831_p5 = scmp.ge.s32.totalorder %s1270_s28, 1  ;;  %p219_p7 = scmp.lt.s32.totalorder %s1270_s28, 5 }
  0x13   : > { %p1369_p4 = por %p1656_p1, %p61_p0  ;;  %p1374_p6 = por %p156_p3, %p61_p0 }
  0x14   : > { %p1379_p8 = pnand %p831_p5, %p219_p7  ;;  %s1272_s10 = smov [#allocation5]  }
  0x15   : > { %s1673_s7 = scalar_select %p1369_p4, 1, 0 }
  0x16   : > { %s1674_s8 = scalar_select %p1374_p6, 1, 0 }
  0x17   : > { %s1676_s9 = scalar_select %p1379_p8, 1, 0 }
  0x18   : > { %1675 = sst [smem:[#allocation16_spill]] %s1674_s8  ;;  %s237_s11 = sshll.u32 %s1272_s10, 4  ;;  %s238_s11 = int_to_ptr.vmem [resolvable:$true] %s237_s11 }
  0x19   : > { %p924_p9 = pneg %p1379_p8  ;;  %s1678_s3 = sld [smem:[#allocation20_spill]] }
  0x1b   : > { %p1387_p10 = pnand %p924_p9, %p1656_p1 }
  0x1d   : > { %p1052_p12 = pneg %p1387_p10 }
  0x1f   : > { %s1050_s15 = scalar_lea.hbm %s1678_s3, 3072 }
  0x20   : > { %p1051_p11 = scmp.ne.s32.totalorder %s1678_s3, %s1050_s15  ;;  %p1057_p3 = scmp.lt.u32.totalorder %s1050_s15, %s1678_s3 }
  0x22   : > { %p1053_p13 = pnand %p1052_p12, %p1051_p11 }
  0x24   : > { %p1054_p0 = pneg %p1053_p13 }
  0x26   : > { %p1059_p5 = pnand %p1057_p3, %p1054_p0 }
  0x28   : > { %1062 = shalt.err (!%p1059_p5)
}
  0x29   : > { %s1063_s20 = scalar_lea.vmem %s238_s11, 3072  ;;  %p1071_p2 = scmp.lt.s32.totalorder %s238_s11, %s238_s11 }
  0x2a   : > { %p1064_p7 = scmp.ne.s32.totalorder %s238_s11, %s1063_s20  ;;  %p1072_p6 = scmp.lt.s32.totalorder %s1063_s20, %s1063_s20 }
  0x2c   : > { %p1066_p9 = pnand %p1064_p7, %p1052_p12  ;;  %p1073_p4 = por %p1072_p6, %p1071_p2 }
  0x2e   : > { %p1067_p1 = pneg %p1066_p9 }
  0x30   : > { %p1074_p8 = pnand %p1073_p4, %p1067_p1 }
  0x32   : > { %1077 = shalt.err (!%p1074_p8)
}
  0x33   : > { %s1273_s10 = smov 192   ;;  %s1274_s13 = smov 12  }
  0x34   : > { %927 = dma.hbm_to_vmem [thread:$0]  (!%p1387_p10), %s1678_s3, 3072, %s238_s11, [#allocation6], %s1273_s10, %s1273_s10, %s1274_s13  }
  0x35   : > { %s36_s16 = sadd.s32 1, %s1262_s26  ;;  %s39_s17 = sadd.s32 1, %s1266_s27 }
  0x36   : > { %p37_p1 = scmp.ge.s32.totalorder %s36_s16, 2  ;;  %s48_s18 = sadd.s32 1, %s1250_s23 }
  0x37   : > { %p55_p2 = scmp.ne.s32.totalorder %s1250_s23, %s1246_s22  ;;  %p56_p4 = scmp.eq.s32.totalorder %s1270_s28, 0 }
  0x38   : > { %s1708_s16 = smov (%p37_p1, %s36_s16), 0  ;;  %s1710_s17 = smov (!%p37_p1, %s39_s17), %s1266_s27 }
  0x39   : > { %1679 = sst [smem:[#allocation17_spill]] %s1708_s16  ;;  %s44_s19 = ssub.s32 %s1262_s26, %s1708_s16 }
  0x3a   : > { %p41_p6 = scmp.ge.s32.totalorder %s1710_s17, 2  ;;  %p1680_p8 = scmp.eq.s32.totalorder %s1358_s29, 3 }
  0x3b   : > { %p1424_p10 = por %p56_p4, %p55_p2  ;;  %p943_p12 = scmp.lt.s32.totalorder %s1270_s28, 4 }
  0x3c   : > { %p1420_p11 = por %p1680_p8, %p55_p2  ;;  %s1712_s17 = smov (%p41_p6, %s1710_s17), 0 }
  0x3d   : > { %s251_s20 = sand.u32 1, %s1250_s23   ;;  %s835_s10 = sshll.u32 %s1266_s27, 1 }
  0x3e   : > { %s1681_s12 = scalar_select %p1420_p11, 1, 0 }
  0x3f   : > { %s43_s13 = ssub.s32 %s1266_s27, %s1712_s17  ;;  %s834_s15 = sshll.u32 %s251_s20, 3 }
  0x40   : > { %1682 = sst [smem:[#allocation18_spill]] %s1681_s12  ;;  %s45_s14 = sor.u32 %s44_s19, %s43_s13 }
  0x41   : > { %p46_p13 = scmp.eq.s32.totalorder %s45_s14, 0  ;;  %s260_s30 = sadd.s32 %s1262_s26, %s835_s10 }
  0x42   : > { %s255_s3 = scalar_lea.vmem [#allocation2], %s834_s15  ;;  %s836_s21 = sshll.u32 %s260_s30, 7 }
  0x43   : > { %s264_s16 = sshll.u32 %s255_s3, 4  ;;  %s1684_s0 = sld [smem:[#allocation19_spill]]  ;;  %s1439_s16 = int_to_ptr.vmem [resolvable:$true] %s264_s16 }
  0x44   : > { %s1437_s8 = scalar_select %p46_p13, %s1250_s23, %s48_s18  }
  0x45   : > { %p1450_p0 = pnand %p943_p12, %p1424_p10  ;;  %s252_s3 = scalar_lea.sflag [#allocation3], %s251_s20 }
  0x47   : > { %p1080_p5 = pneg %p1450_p0 }
  0x49   : > { %s1444_s12 = scalar_lea.hbm %s1684_s0, %s836_s21  ;;  %s1083_s21 = scalar_lea.hbm %s1684_s0, 512 }
  0x4a   : > { %s1078_s30 = scalar_lea.hbm %s1444_s12, 128  ;;  %p1084_p1 = scmp.lt.u32.totalorder %s1444_s12, %s1684_s0 }
  0x4b   : > { %p1079_p3 = scmp.ne.s32.totalorder %s1444_s12, %s1078_s30  ;;  %p1085_p2 = scmp.lt.u32.totalorder %s1083_s21, %s1078_s30 }
  0x4c   : > { %p1087_p6 = scmp.lt.u32.totalorder %s1078_s30, %s1444_s12 }
  0x4d   : > { %p1081_p7 = pnand %p1080_p5, %p1079_p3  ;;  %p1086_p4 = por %p1085_p2, %p1084_p1 }
  0x4f   : > { %p1082_p9 = pneg %p1081_p7  ;;  %p1088_p8 = por %p1087_p6, %p1086_p4 }
  0x51   : > { %p1089_p10 = pnand %p1088_p8, %p1082_p9 }
  0x53   : > { %1092 = shalt.err (!%p1089_p10)
}
  0x54   : > { %s1093_s20 = scalar_lea.vmem %s1439_s16, 128  ;;  %s1275_s10 = smov [#allocation2]  }
  0x55   : > { %p1094_p12 = scmp.ne.s32.totalorder %s1439_s16, %s1093_s20  ;;  %s1098_s13 = sshll.u32 %s1275_s10, 4  ;;  %s1099_s13 = int_to_ptr.vmem [resolvable:$false] %s1098_s13 }
  0x56   : > { %s1100_s14 = scalar_lea.vmem %s1099_s13, 256  ;;  %p1101_p7 = scmp.lt.s32.totalorder %s1439_s16, %s1099_s13 }
  0x57   : > { %p1096_p13 = pnand %p1094_p12, %p1080_p5  ;;  %p1102_p1 = scmp.lt.s32.totalorder %s1100_s14, %s1093_s20 }
  0x59   : > { %p1097_p3 = pneg %p1096_p13  ;;  %p1103_p2 = por %p1102_p1, %p1101_p7 }
  0x5b   : > { %p1104_p4 = pnand %p1103_p2, %p1097_p3 }
  0x5d   : > { %1107 = shalt.err (!%p1104_p4)
}
  0x5e   : > { %931 = dma.hbm_to_vmem [thread:$0]  (!%p1450_p0), %s1444_s12, 128, %s1439_s16, %s252_s3  }
  0x5f   : > { %p1686_p9 = scmp.ne.s32.totalorder %s1676_s9, 0 }
  0x60   : > { %s1482_s15 = sand.u32 (!%p1686_p9), 1, %s1246_s22   ;;  %p1687_p5 = scmp.ne.s32.totalorder (!%p1686_p9), %s1673_s7, 0 }
  0x61   : > { %273 = sbr.rel (%p1686_p9) target bundleno = 703 (0x2bf), region = 36  ;;  %s1667_s30 = sshll.u32 (!%p1686_p9), %s1482_s15, 3 }
  0x62   : > { %s276_s5 = scalar_lea.sflag (!%p1686_p9), [#allocation3], %s1482_s15  ;;  %s279_s6 = scalar_lea.vmem (!%p1686_p9), [#allocation2], %s1667_s30 }
  0x68   : > { %1225 = dma.done.wait (%p1687_p5), %s276_s5, 128  }
  0x69   : > { %1227 = vsyncadd (%p1687_p5), %s276_s5, 4294967168  ;;  %p1688_p0 = scmp.eq.s32.totalorder %s1358_s29, 0 }
  0x6b   : > { %1229 = dma.done.wait (%p1688_p0), [#allocation6], 3072   ;;  %p1689_p6 = pmov %p1688_p0 }
  0x6c   : > { %v323_v0 = vld [vmem:[%s279_s6] sm:$0xff]  ;;  %v1018_v2 = vld [vmem:[#allocation5] ss:$12 sps:$4 sm:$0xff]   ;;  %v1276_v3 = vmov 0.0   ;;  %v1277_v25 = vmov 0   ;;  %vm1278_vm0 = vmmov 0  }
  0x6d   : > { %1231 = vsyncadd (%p1689_p6), [#allocation6], 4294964224  ;;  %326 = vadd.xlane.f32.xlu0 %v323_v0  ;;  %v1016_v1 = vld [vmem:[#allocation5 + $0x4] ss:$12 sps:$4 sm:$0xff]   ;;  %889 = vmatprep.subr.bf16.mxu1 %v1276_v3  ;;  %v1019_v4 = vld [vmem:[#allocation5 + $0x8] ss:$12 sps:$4 sm:$0xff]  }
  0x6e   : > { %v1020_v5 = vld [vmem:[#allocation5 + $0x1c] ss:$12 sps:$4 sm:$0xff]   ;;  %513 = vmatprep.subr.bf16.mxu0 %v1016_v1  ;;  %890 = vmatpush3.bf16.msra.mxu1 %v1019_v4  ;;  %v1022_v6 = vld [vmem:[#allocation5 + $0x18] ss:$12 sps:$4 sm:$0xff]   ;;  %v1023_v7 = vld [vmem:[#allocation5 + $0x20] ss:$12 sps:$4 sm:$0xff]  }
  0x6f   : > { %514 = vmatpush1.bf16.msra.mxu0 %v1018_v2  ;;  %891 = vmatprep.subr.bf16.mxu1 %v1276_v3  ;;  %v1024_v8 = vld [vmem:[#allocation5 + $0x34] ss:$12 sps:$4 sm:$0xff]   ;;  %v1026_v13 = vld [vmem:[#allocation5 + $0x30] ss:$12 sps:$4 sm:$0xff]   ;;  %v1027_v14 = vld [vmem:[#allocation5 + $0x38] ss:$12 sps:$4 sm:$0xff]  }
  0x70   : > { %515 = vmatprep.subr.bf16.mxu0 %v1020_v5  ;;  %v1028_v15 = vld [vmem:[#allocation5 + $0x4c] ss:$12 sps:$4 sm:$0xff]   ;;  %v1030_v16 = vld [vmem:[#allocation5 + $0x48] ss:$12 sps:$4 sm:$0xff]   ;;  %v1031_v17 = vld [vmem:[#allocation5 + $0x50] ss:$12 sps:$4 sm:$0xff]   ;;  %545 = vmatprep.mubr.bf16.mxu0 %v1277_v25 }
  0x71   : > { %v1032_v18 = vld [vmem:[#allocation5 + $0x64] ss:$12 sps:$4 sm:$0xff]   ;;  %v1034_v19 = vld [vmem:[#allocation5 + $0x60] ss:$12 sps:$4 sm:$0xff]   ;;  %v1035_v20 = vld [vmem:[#allocation5 + $0x68] ss:$12 sps:$4 sm:$0xff]   ;;  %905 = vmatprep.mubr.msk.bf16.mxu1 %vm1278_vm0, %v1276_v3 }
  0x72   : > { %892 = vmatpush3.bf16.msra.mxu1 %v1023_v7  ;;  %v1036_v21 = vld [vmem:[#allocation5 + $0x7c] ss:$12 sps:$4 sm:$0xff]   ;;  %v1038_v22 = vld [vmem:[#allocation5 + $0x78] ss:$12 sps:$4 sm:$0xff]   ;;  %v1039_v23 = vld [vmem:[#allocation5 + $0x80] ss:$12 sps:$4 sm:$0xff]  }
  0x73   : > { %516 = vmatpush1.bf16.msra.mxu0 %v1022_v6  ;;  %893 = vmatprep.subr.bf16.mxu1 %v1276_v3  ;;  %v1040_v24 = vld [vmem:[#allocation5 + $0x94] ss:$12 sps:$4 sm:$0xff]   ;;  %v1042_v26 = vld [vmem:[#allocation5 + $0x90] ss:$12 sps:$4 sm:$0xff]   ;;  %v1043_v27 = vld [vmem:[#allocation5 + $0x98] ss:$12 sps:$4 sm:$0xff]  }
  0x74   : > { %517 = vmatprep.subr.bf16.mxu0 %v1024_v8  ;;  %v1044_v28 = vld [vmem:[#allocation5 + $0xac] ss:$12 sps:$4 sm:$0xff]   ;;  %v1046_v29 = vld [vmem:[#allocation5 + $0xa8] ss:$12 sps:$4 sm:$0xff]   ;;  %v1047_v30 = vld [vmem:[#allocation5 + $0xb0] ss:$12 sps:$4 sm:$0xff]  }
  0x75   : > { %v842_v35 = vld [vmem:[%s1650_s1] ss:$0 sm:$0xff]  ;;  %s909_s19 = smul.u32 24, %s1482_s15  ;;  %s840_s18 = sshll.u32 %s1482_s15, 2 }
  0x76   : > { %894 = vmatpush3.bf16.msra.mxu1 %v1027_v14  ;;  %v843_v37 = vld [vmem:[%s1651_s2] ss:$0 sm:$0xff]  ;;  %s910_s3 = smul.u32 3, %s1254_s24  ;;  %s872_s11 = sshll.u32 %s1258_s25, 1 }
  0x77   : > { %518 = vmatpush1.bf16.msra.mxu0 %v1026_v13  ;;  %895 = vmatprep.subr.bf16.mxu1 %v1276_v3  ;;  %s911_s21 = smul.u32 6, %s1258_s25  ;;  %s307_s20 = scalar_lea.vmem [#allocation7], %s909_s19 }
  0x78   : > { %519 = vmatprep.subr.bf16.mxu0 %v1028_v15  ;;  %s636_s10 = sshll.u32 %s307_s20, 4  ;;  %s874_s5 = sshll.u32 %s1254_s24, 1  ;;  %s1511_s10 = int_to_ptr.vmem [resolvable:$true] %s636_s10 }
  0x79   : > { %s632_s14 = sadd.s32 %s911_s21, %s910_s3  ;;  %s875_s6 = sshll.u32 %s1258_s25, 2 }
  0x7a   : > { %896 = vmatpush3.bf16.msra.mxu1 %v1031_v17  ;;  %s647_s7 = sadd.s32 %s1254_s24, %s872_s11  ;;  %s871_s9 = sshll.u32 %s632_s14, 7 }
  0x7b   : > { %520 = vmatpush1.bf16.msra.mxu0 %v1030_v16  ;;  %897 = vmatprep.subr.bf16.mxu1 %v1276_v3  ;;  %s1513_s16 = sadd.s32 %s875_s6, %s874_s5  ;;  %s873_s12 = sshll.u32 %s647_s7, 6 }
  0x7c   : > { %521 = vmatprep.subr.bf16.mxu0 %v1032_v18  ;;  %s1515_s30 = scalar_lea.vmem [#allocation8], %s840_s18  ;;  %s1521_s3 = scalar_lea.hbm %s1653_s4, %s871_s9 }
  0x7d   : > { %s651_s0 = sshll.u32 %s1515_s30, 4  ;;  %s876_s25 = sshll.u32 %s1513_s16, 6  ;;  %s1534_s0 = int_to_ptr.vmem [resolvable:$true] %s651_s0 }
  0x7e   : > { %898 = vmatpush3.bf16.msra.mxu1 %v1035_v20  ;;  %s1691_s21 = sshll.u32 %s1482_s15, 3  ;;  %s1692_s5 = sld [smem:[#allocation21_spill]] }
  0x7f   : > { %522 = vmatpush1.bf16.msra.mxu0 %v1034_v19  ;;  %899 = vmatprep.subr.bf16.mxu1 %v1276_v3  ;;  %s1526_s18 = scalar_lea.vmem [#allocation10], %s1691_s21  ;;  %s610_s7 = scalar_lea.sflag [#allocation4], %s1482_s15 }
  0x80   : > { %523 = vmatprep.subr.bf16.mxu0 %v1036_v21  ;;  %s667_s11 = sshll.u32 %s1526_s18, 4  ;;  %s1108_s9 = scalar_lea.vmem %s1511_s10, 384  ;;  %s1568_s11 = int_to_ptr.vmem [resolvable:$true] %s667_s11 }
  0x81   : > { %p1109_p8 = scmp.ne.s32.totalorder %s1511_s10, %s1108_s9 }
  0x82   : > { %900 = vmatpush3.bf16.msra.mxu1 %v1039_v23 }
  0x83   : > { %524 = vmatpush1.bf16.msra.mxu0 %v1038_v22  ;;  %901 = vmatprep.subr.bf16.mxu1 %v1276_v3  ;;  %p1110_p10 = pnand %p1109_p8, %p1420_p11 }
  0x84   : > { %525 = vmatprep.subr.bf16.mxu0 %v1040_v24  ;;  %s1532_s6 = scalar_lea.hbm %s1692_s5, %s873_s12 }
  0x85   : > { %p1111_p12 = pneg %p1110_p10 }
  0x86   : > { %902 = vmatpush3.bf16.msra.mxu1 %v1043_v27 }
  0x87   : > { %526 = vmatpush1.bf16.msra.mxu0 %v1042_v26  ;;  %903 = vmatprep.subr.bf16.mxu1 %v1276_v3 }
  0x88   : > { %527 = vmatprep.subr.bf16.mxu0 %v1044_v28 }
  0x8a   : > { %904 = vmatpush3.bf16.msra.mxu1 %v1047_v30 }
  0x8b   : > { %528 = vmatpush1.bf16.msra.mxu0 %v1046_v29 }
  0xfa   : > { %v327_v9 = vpop.xlane.xlu0 %326 }
  0xfb   : > { %v329_v10 = vmul.f32 0.0078125, %v327_v9 }
  0xfd   : > { %v330_v11 = vsub.f32 %v323_v0, %v329_v10 }
  0xff   : > { %v331_v12 = vmul.f32 %v330_v11, %v330_v11 }
 0x101   : > { %332 = vadd.xlane.f32.xlu0 %v331_v12 }
 0x18e   : > { %v333_v31 = vpop.xlane.xlu0 %332 }
 0x18f   : > { %v334_v32 = vmul.f32 0.0078125, %v333_v31 }
 0x191   : > { %v335_v33 = vadd.f32 1e-05, %v334_v32 }
 0x193   : > { %1048 = vrsqrt.f32 %v335_v33 }
 0x19d   : > { %v1049_v34 = vpop.eup %1048 }
 0x19e   : > { %v337_v36 = vmul.f32 %v1049_v34, %v330_v11 }
 0x1a0   : > { %v344_v38 = vmul.f32 %v842_v35, %v337_v36 }
 0x1a2   : > { %v351_v39 = vadd.f32 %v843_v37, %v344_v38 }
 0x1a4   : > { %v352_v40 = vpack.c.bf16 %v351_v39, %v351_v39 }
 0x1a6   : > { %546 = vmatmul.mubr.bf16.vlgmr.msra.gmra.mrb[0].mxu0 %v352_v40  ;;  %906 = vmatmul.mubr.bf16.vlgmr.msra.gmra.mrb[0].mxu1 %v352_v40 }
 0x279   : > { %v547_v41 = vpop.f32.mrb[0].mxu0  ;;  %v588_v42 = vpop.f32.mrb[0].mxu1 }
 0x27a   : > { %594 = vst [vmem:[%s307_s20] sm:$0xff] %v547_v41  ;;  %v597_v43 = vmul.f32 0.17677669, %v547_v41  ;;  %596 = vst [vmem:[%s307_s20 + $0x10] sm:$0xff] %v588_v42  ;;  %v549_v44 = vpop.f32.mrb[1].mxu0  ;;  %v907_v45 = vpop.f32.mrb[1].mxu1 }
 0x27b   : > { %595 = vst [vmem:[%s307_s20 + $0x8] sm:$0xff] %v549_v44  ;;  %v879_v46 = vpack.c.bf16 %v588_v42, %v549_v44  ;;  %v551_v47 = vpop.f32.mrb[2].mxu0  ;;  %v591_v48 = vpop.f32.mrb[2].mxu1  ;;  %s1279_s20 = smov [#allocation7]  }
 0x27c   : > { %v598_v49 = vpack.c.bf16 %v597_v43, %v597_v43  ;;  %v552_v50 = vpop.f32.mrb[3].mxu0  ;;  %v908_v51 = vpop.f32.mrb[3].mxu1  ;;  %s1112_s19 = sshll.u32 %s1279_s20, 4  ;;  %s1113_s19 = int_to_ptr.vmem [resolvable:$false] %s1112_s19 }
 0x27d   : > { %s1114_s21 = scalar_lea.vmem %s1113_s19, 768  ;;  %p1115_p13 = scmp.lt.s32.totalorder %s1511_s10, %s1113_s19 }
 0x27e   : > { %p1116_p3 = scmp.lt.s32.totalorder %s1114_s21, %s1108_s9 }
 0x280   : > { %p1117_p7 = por %p1116_p3, %p1115_p13 }
 0x282   : > { %p1118_p1 = pnand %p1117_p7, %p1111_p12 }
 0x284   : > { %1121 = shalt.err (!%p1118_p1)
}
 0x285   : > { %s1122_s15 = scalar_lea.hbm %s1521_s3, 384  ;;  %s1126_s14 = scalar_lea.hbm %s1653_s4, 1536 }
 0x286   : > { %p1123_p2 = scmp.ne.s32.totalorder %s1521_s3, %s1122_s15  ;;  %p1127_p5 = scmp.lt.u32.totalorder %s1521_s3, %s1653_s4 }
 0x287   : > { %p1128_p0 = scmp.lt.u32.totalorder %s1126_s14, %s1122_s15  ;;  %p1130_p8 = scmp.lt.u32.totalorder %s1122_s15, %s1521_s3 }
 0x288   : > { %p1124_p4 = pnand %p1123_p2, %p1420_p11 }
 0x289   : > { %p1129_p6 = por %p1128_p0, %p1127_p5 }
 0x28a   : > { %p1125_p9 = pneg %p1124_p4 }
 0x28b   : > { %p1131_p10 = por %p1130_p8, %p1129_p6 }
 0x28d   : > { %p1132_p12 = pnand %p1131_p10, %p1125_p9 }
 0x28f   : > { %1135 = shalt.err (!%p1132_p12)
}
 0x290   : > { %918 = dma.vmem_to_hbm [thread:$0]  (%p1420_p11), %s1511_s10, 384, %s1521_s3, %s610_s7   ;;  %608 = vst [vmem:[%s1526_s18] sm:$0xff] %v879_v46  ;;  %599 = vst [vmem:[%s1515_s30] sm:$0xf] %v598_v49 }
 0x291   : > { %s1693_s15 = sld [smem:[#allocation22_spill]]  ;;  %s1694_s13 = sand.u32 1, %s1358_s29  }
 0x292   : > { %s1573_s14 = scalar_lea.sflag [#allocation9], %s1694_s13  ;;  %s1136_s20 = scalar_lea.vmem %s1534_s0, 64 }
 0x293   : > { %p1137_p13 = scmp.ne.s32.totalorder %s1534_s0, %s1136_s20  ;;  %s1280_s10 = smov [#allocation8]  }
 0x294   : > { %s1140_s3 = sshll.u32 %s1280_s10, 4  ;;  %s1141_s3 = int_to_ptr.vmem [resolvable:$false] %s1140_s3 }
 0x295   : > { %p1138_p3 = pnand %p1137_p13, %p1420_p11  ;;  %s1142_s16 = scalar_lea.vmem %s1141_s3, 128 }
 0x296   : > { %p1143_p1 = scmp.lt.s32.totalorder %s1534_s0, %s1141_s3  ;;  %p1144_p2 = scmp.lt.s32.totalorder %s1142_s16, %s1136_s20 }
 0x297   : > { %s1564_s12 = scalar_lea.hbm %s1693_s15, %s876_s25  ;;  %p1139_p7 = pneg %p1138_p3 }
 0x298   : > { %p1145_p4 = por %p1144_p2, %p1143_p1 }
 0x29a   : > { %p1146_p9 = pnand %p1145_p4, %p1139_p7 }
 0x29c   : > { %1149 = shalt.err (!%p1146_p9)
}
 0x29d   : > { %s1150_s29 = scalar_lea.hbm %s1532_s6, 64  ;;  %s1154_s18 = scalar_lea.hbm %s1692_s5, 256 }
 0x29e   : > { %p1151_p5 = scmp.ne.s32.totalorder %s1532_s6, %s1150_s29  ;;  %p1155_p8 = scmp.lt.u32.totalorder %s1532_s6, %s1692_s5 }
 0x29f   : > { %p1156_p10 = scmp.lt.u32.totalorder %s1154_s18, %s1150_s29  ;;  %p1158_p13 = scmp.lt.u32.totalorder %s1150_s29, %s1532_s6 }
 0x2a0   : > { %p1152_p0 = pnand %p1151_p5, %p1420_p11 }
 0x2a1   : > { %p1157_p12 = por %p1156_p10, %p1155_p8 }
 0x2a2   : > { %p1153_p6 = pneg %p1152_p0 }
 0x2a3   : > { %p1159_p3 = por %p1158_p13, %p1157_p12 }
 0x2a5   : > { %p1160_p7 = pnand %p1159_p3, %p1153_p6 }
 0x2a7   : > { %1163 = shalt.err (!%p1160_p7)
}
 0x2a8   : > { %919 = dma.vmem_to_hbm [thread:$0]  (%p1420_p11), %s1534_s0, 64, %s1532_s6, %s1573_s14  }
 0x2a9   : > { %s1164_s9 = scalar_lea.vmem %s1568_s11, 128  ;;  %s1281_s21 = smov [#allocation10]  }
 0x2aa   : > { %p1165_p1 = scmp.ne.s32.totalorder %s1568_s11, %s1164_s9  ;;  %s1168_s13 = sshll.u32 %s1281_s21, 4  ;;  %s1169_s13 = int_to_ptr.vmem [resolvable:$false] %s1168_s13 }
 0x2ab   : > { %s1170_s20 = scalar_lea.vmem %s1169_s13, 256  ;;  %p1171_p9 = scmp.lt.s32.totalorder %s1568_s11, %s1169_s13 }
 0x2ac   : > { %p1166_p2 = pnand %p1165_p1, %p1420_p11  ;;  %p1172_p5 = scmp.lt.s32.totalorder %s1170_s20, %s1164_s9 }
 0x2ae   : > { %p1167_p4 = pneg %p1166_p2  ;;  %p1173_p0 = por %p1172_p5, %p1171_p9 }
 0x2b0   : > { %p1174_p6 = pnand %p1173_p0, %p1167_p4 }
 0x2b2   : > { %1177 = shalt.err (!%p1174_p6)
}
 0x2b3   : > { %s1178_s0 = scalar_lea.hbm %s1564_s12, 128  ;;  %s1182_s3 = scalar_lea.hbm %s1693_s15, 512 }
 0x2b4   : > { %p1179_p8 = scmp.ne.s32.totalorder %s1564_s12, %s1178_s0  ;;  %p1183_p13 = scmp.lt.u32.totalorder %s1564_s12, %s1693_s15 }
 0x2b5   : > { %p1184_p3 = scmp.lt.u32.totalorder %s1182_s3, %s1178_s0  ;;  %p1186_p1 = scmp.lt.u32.totalorder %s1178_s0, %s1564_s12 }
 0x2b6   : > { %p1180_p10 = pnand %p1179_p8, %p1420_p11 }
 0x2b7   : > { %p1185_p7 = por %p1184_p3, %p1183_p13 }
 0x2b8   : > { %p1181_p12 = pneg %p1180_p10 }
 0x2b9   : > { %p1187_p2 = por %p1186_p1, %p1185_p7 }
 0x2bb   : > { %p1188_p4 = pnand %p1187_p2, %p1181_p12 }
 0x2bd   : > { %1191 = shalt.err (!%p1188_p4)
}
 0x2be   : > { %920 = dma.vmem_to_hbm [thread:$0]  (%p1420_p11), %s1568_s11, 128, %s1564_s12, %s1573_s14  }
 0x2bf PF: > { %s1695_s30 = sld [smem:[#allocation15_spill]]  ;;  %s1696_s25 = sld [smem:[#allocation16_spill]] }
 0x2c0   : > { %p945_p9 = scmp.ge.s32.totalorder %s1270_s28, 2 }
 0x2c5   : > { %s679_s18 = sand.u32 1, %s1695_s30   ;;  %p1697_p5 = scmp.ne.s32.totalorder %s1696_s25, 0 }
 0x2c6   : > { %s680_s7 = scalar_lea.sflag [#allocation4], %s679_s18 }
 0x2c7   : > { %p933_p0 = pnand %p945_p9, %p1697_p5 }
 0x2c9   : > { %1233 = dma.done.wait (!%p933_p0), %s680_s7, 384  }
 0x2ca   : > { %1235 = vsyncadd (!%p933_p0), %s680_s7, 4294966912  ;;  %s1698_s19 = sadd.s32 4294967294, %s1270_s28  }
 0x2cb   : > { %s688_s9 = sand.u32 1, %s1698_s19  }
 0x2cc   : > { %s689_s21 = scalar_lea.sflag [#allocation9], %s688_s9 }
 0x2cd   : > { %1237 = dma.done.wait (!%p933_p0), %s689_s21, 192  }
 0x2ce   : > { %1239 = vsyncadd (!%p933_p0), %s689_s21, 4294967104  ;;  %s27_s28 = sadd.s32 1, %s1270_s28   ;;  %s1699_s11 = sld [smem:[#allocation17_spill]] }
 0x2cf   : > { %p24_p11 = scmp.ge.s32.totalorder %s27_s28, 6   ;;  %s1700_s21 = smov %s1246_s22 }
 0x2d0   : > { %s1701_s22 = smov %s1250_s23  ;;  %s1702_s23 = smov %s1437_s8 }
 0x2d1   : > { %s1703_s24 = smov %s1262_s26  ;;  %s1704_s25 = smov %s1266_s27 }
 0x2d2   : > { %s1706_s27 = smov %s1712_s17  ;;  %26 = sbr.rel (!%p24_p11) target bundleno = 15 (0xf), region = 117 }
 0x2d4   : > { %s1705_s26 = smov %s1699_s11 }
 0x2d9   :  { %703 = vsyncpa [#allocation3], 1 }
 0x2da   :  { %705 = vsyncpa [#allocation3 + $0x1], 1 }
 0x2db   :  { %706 = vsyncpa [#allocation6], 1 }
 0x2dc   :  { %707 = vsyncpa [#allocation4], 1 }
 0x2dd   :  { %709 = vsyncpa [#allocation4 + $0x1], 1 }
 0x2de   :  { %710 = vsyncpa [#allocation9], 1 }
 0x2df   :  { %712 = vsyncpa [#allocation9 + $0x1], 1 }

</bundles_post_ra>
